<compile_context>
chip_gen: v7x
topology: tpu7x:2x2x1
jax: 0.10.0
libtpu: 0.0.40
codegen_flags: <defaults>
</compile_context>

<pallas_src>
import jax
import jax.numpy as jnp
from jax.experimental import pallas as pl
from jax.experimental.pallas import tpu as pltpu


# ---------------------------------------------------------------------------
# helpers
# ---------------------------------------------------------------------------
def _round_up(x, m):
    return ((x + m - 1) // m) * m


def _cdiv(a, b):
    return -(-a // b)


def _choose_tile(n, max_tile=512, unit=8):
    """Pick (tile, padded_total) for a 'parallel' row axis of logical size n.

    tile is a multiple of `unit`, padded_total % tile == 0 with minimal
    padding waste, and the grid has >=2 steps whenever possible so megacore
    (v7x, 2 TCs/chip) can split the parallel axis across both TensorCores.
    """
    nu = _round_up(max(n, unit), unit)
    if nu <= max_tile:
        if nu >= 2 * unit:
            t = _round_up(_cdiv(nu, 2), unit)
            return t, 2 * t
        return nu, nu
    steps = _cdiv(nu, max_tile)
    t = _round_up(_cdiv(nu, steps), unit)
    return t, t * steps


# ---------------------------------------------------------------------------
# Pallas kernels
# ---------------------------------------------------------------------------
def _conv_pool_kernel(s_ref, t_ref, b_ref, o_ref):
    """Fused valid conv (stride 1) + bias + ReLU + 2x2/2 maxpool as GEMMs.

    s_ref: (kh+1, TM, Cin*W) bf16 -- row slab r holds input rows {r, r+2, ...}
           flattened over (batch, pooled-row); lane index = ci*W + x.
    t_ref: (2, kh, Cin*W, L) bf16 -- Toeplitz weights; [dx, i] maps one input
           row to all pooled output columns for kernel-row i and pool-column
           offset dx; lane index = co*pw + px, zero-padded to L (mult of 128).
    b_ref: (1, L) f32 bias pattern over (co, px) lanes.
    o_ref: (TM, L) bf16 pooled output tile (lane-dense).
    """
    kh = t_ref.shape[1]
    y = None
    for dy in range(2):
        for dx in range(2):
            acc = None
            for i in range(kh):
                d = jnp.dot(s_ref[dy + i], t_ref[dx, i],
                            preferred_element_type=jnp.float32)
                acc = d if acc is None else acc + d
            y = acc if y is None else jnp.maximum(y, acc)
    # Bias is per-channel (constant across the 2x2 window) and ReLU is
    # monotone, so relu(max_window(conv) + b) == maxpool(relu(conv + b)).
    o_ref[...] = jnp.maximum(y + b_ref[...], 0.0).astype(o_ref.dtype)


def _fc_head_kernel(x_ref, w1_ref, b1_ref, w2_ref, b2_ref, w3_ref, b3_ref,
                    o_ref):
    # Fused fc1+ReLU -> fc2+ReLU -> fc3; intermediates stay in VMEM, cast to
    # bf16 between GEMMs so every matmul runs at native MXU bf16 rate.
    h = jnp.dot(x_ref[...], w1_ref[...], preferred_element_type=jnp.float32)
    h = jnp.maximum(h + b1_ref[...], 0.0).astype(jnp.bfloat16)
    h = jnp.dot(h, w2_ref[...], preferred_element_type=jnp.float32)
    h = jnp.maximum(h + b2_ref[...], 0.0).astype(jnp.bfloat16)
    o = jnp.dot(h, w3_ref[...], preferred_element_type=jnp.float32)
    o_ref[...] = o + b3_ref[...]


# ---------------------------------------------------------------------------
# Wrappers
# ---------------------------------------------------------------------------
def _pool_conv_toeplitz(w, w_in, pw, l_pad):
    """Build (2, kh, Cin*W_in, l_pad) Toeplitz weights for conv+pool-columns.

    T[dx, i][(ci, u), (co, px)] = w[co, ci, i, u - 2*px - dx] when
    0 <= u - 2*px - dx < kw, else 0.  Lane dim zero-padded to l_pad.
    """
    cout, cin, kh, kw = w.shape
    u = jnp.arange(w_in)[:, None]                   # (W_in, 1)
    px = jnp.arange(pw)[None, :]                    # (1, pw)
    by_dx = []
    for dx in range(2):
        by_i = []
        for i in range(kh):
            j = u - 2 * px - dx                     # (W_in, pw)
            mask = (j >= 0) & (j < kw)
            jc = jnp.clip(j, 0, kw - 1)
            wi = jnp.transpose(w[:, :, i, :], (1, 0, 2))         # (Cin, Cout, kw)
            g = jnp.where(mask[None, None], wi[:, :, jc], 0.0)   # (Cin, Cout, W_in, pw)
            by_i.append(jnp.transpose(g, (0, 2, 1, 3)).reshape(cin * w_in, cout * pw))
        by_dx.append(jnp.stack(by_i, 0))
    t = jnp.stack(by_dx, 0)                         # (2, kh, Cin*W_in, Cout*pw)
    if l_pad > cout * pw:
        t = jnp.pad(t, ((0, 0), (0, 0), (0, 0), (0, l_pad - cout * pw)))
    return t


def conv_relu_pool(xr, w, b, *, max_tile=512):
    """Fused conv + bias + ReLU + 2x2/2 maxpool.

    xr: (B, H, Cin*W) activation in "row format" (lane = ci*W + x), any float.
    w:  (Cout, Cin, kh, kw) f32, b: (Cout,) f32.
    Returns (B, H_pool, Cout*W_pool) bf16 in the same row format
    (lane = co*W_pool + px), ready to feed the next conv stage directly.
    """
    B, H, cw = xr.shape
    cout, cin, kh, kw = w.shape
    w_in = cw // cin
    assert cin * w_in == cw
    oh, ow = H - kh + 1, w_in - kw + 1
    ph, pw = oh // 2, ow // 2
    L = cout * pw
    Lp = _round_up(L, 128)                          # lane-dense output

    # kh+1 stride-2 row slabs: slab r holds exactly the input rows that pooled
    # output row py needs at row offset r = dy + i (rows r, r+2, ...).
    nslab = kh + 1
    slabs = jnp.stack([xr[:, r:r + 2 * ph - 1:2, :] for r in range(nslab)], 0)
    M = B * ph
    TM, Mp = _choose_tile(M, max_tile=max_tile)
    slabs = slabs.reshape(nslab, M, cw).astype(jnp.bfloat16)
    if Mp != M:
        slabs = jnp.pad(slabs, ((0, 0), (0, Mp - M), (0, 0)))

    t = _pool_conv_toeplitz(w, w_in, pw, Lp).astype(jnp.bfloat16)
    b_pat = jnp.pad(jnp.repeat(b.astype(jnp.float32), pw), (0, Lp - L)).reshape(1, Lp)

    flops = 2 * (2 * 2 * kh) * Mp * cw * Lp
    bytes_accessed = 2 * (slabs.size + t.size + Mp * Lp) + 4 * Lp

    out = pl.pallas_call(
        _conv_pool_kernel,
        out_shape=jax.ShapeDtypeStruct((Mp, Lp), jnp.bfloat16),
        grid=(Mp // TM,),
        in_specs=[
            pl.BlockSpec((nslab, TM, cw), lambda m: (0, m, 0)),
            pl.BlockSpec((2, kh, cw, Lp), lambda m: (0, 0, 0, 0)),
            pl.BlockSpec((1, Lp), lambda m: (0, 0)),
        ],
        out_specs=pl.BlockSpec((TM, Lp), lambda m: (m, 0)),
        compiler_params=pltpu.CompilerParams(
            dimension_semantics=("parallel",)),
        cost_estimate=pl.CostEstimate(
            flops=flops, transcendentals=0, bytes_accessed=bytes_accessed),
    )(slabs, t, b_pat)

    return out[:M, :L].reshape(B, ph, L)


def fc_head(x, w1, b1, w2, b2, w3, b3, *, max_tile=512):
    """x: (B, 400) -> (B, 10). One fused kernel for fc1+ReLU, fc2+ReLU, fc3.

    All hidden/output widths are zero-padded to 128 lanes (exactly neutral
    through matmul+bias+ReLU) so every store in the kernel is lane-dense.
    """
    B, K = x.shape
    n_out = w3.shape[1]
    TB, Bp = _choose_tile(B, max_tile=max_tile)
    if Bp != B:
        x = jnp.pad(x, ((0, Bp - B), (0, 0)))
    x = x.astype(jnp.bfloat16)

    H1 = _round_up(w1.shape[1], 128)
    H2 = _round_up(w2.shape[1], 128)
    NO = _round_up(n_out, 128)

    def pad2(a, r, c):
        return jnp.pad(a, ((0, r - a.shape[0]), (0, c - a.shape[1]))).astype(jnp.bfloat16)

    def padb(a, c):
        return jnp.pad(a.astype(jnp.float32), (0, c - a.shape[0])).reshape(1, c)

    w1p, w2p, w3p = pad2(w1, K, H1), pad2(w2, H1, H2), pad2(w3, H2, NO)
    b1p, b2p, b3p = padb(b1, H1), padb(b2, H2), padb(b3, NO)

    flops = 2 * Bp * (K * H1 + H1 * H2 + H2 * NO)
    bytes_accessed = (2 * (Bp * K + K * H1 + H1 * H2 + H2 * NO)
                      + 4 * (H1 + H2 + NO + Bp * NO))

    out = pl.pallas_call(
        _fc_head_kernel,
        out_shape=jax.ShapeDtypeStruct((Bp, NO), jnp.float32),
        grid=(Bp // TB,),
        in_specs=[
            pl.BlockSpec((TB, K), lambda i: (i, 0)),
            pl.BlockSpec((K, H1), lambda i: (0, 0)),
            pl.BlockSpec((1, H1), lambda i: (0, 0)),
            pl.BlockSpec((H1, H2), lambda i: (0, 0)),
            pl.BlockSpec((1, H2), lambda i: (0, 0)),
            pl.BlockSpec((H2, NO), lambda i: (0, 0)),
            pl.BlockSpec((1, NO), lambda i: (0, 0)),
        ],
        out_specs=pl.BlockSpec((TB, NO), lambda i: (i, 0)),
        compiler_params=pltpu.CompilerParams(
            dimension_semantics=("parallel",)),
        cost_estimate=pl.CostEstimate(
            flops=flops, transcendentals=0, bytes_accessed=bytes_accessed),
    )(x, w1p, b1p, w2p, b2p, w3p, b3p)
    return out[:B, :n_out]


# ---------------------------------------------------------------------------
# The network
# ---------------------------------------------------------------------------
def init_params(key):
    def uniform(key, shape, fan_in):
        bound = 1.0 / jnp.sqrt(jnp.float32(fan_in))
        return jax.random.uniform(key, shape, jnp.float32, -bound, bound)

    ks = jax.random.split(key, 10)
    p = {}
    p["conv1_w"] = uniform(ks[0], (6, 3, 5, 5), 3 * 5 * 5)
    p["conv1_b"] = uniform(ks[1], (6,), 3 * 5 * 5)
    p["conv2_w"] = uniform(ks[2], (16, 6, 5, 5), 6 * 5 * 5)
    p["conv2_b"] = uniform(ks[3], (16,), 6 * 5 * 5)
    p["fc1_w"] = uniform(ks[4], (400, 120), 400)
    p["fc1_b"] = uniform(ks[5], (120,), 400)
    p["fc2_w"] = uniform(ks[6], (120, 84), 120)
    p["fc2_b"] = uniform(ks[7], (84,), 120)
    p["fc3_w"] = uniform(ks[8], (84, 10), 84)
    p["fc3_b"] = uniform(ks[9], (10,), 84)
    return p


@jax.jit
def net_forward(params, x):
    # x: (B, 3, 32, 32) float32 (NCHW, like PyTorch).
    B = x.shape[0]
    # One tiny transpose to "row format" (B, H, Cin*W), lane = ci*W + x_col.
    # Conv kernel outputs come back already in this format, so no activation
    # relayouts are needed between the two conv stages.
    xr = jnp.transpose(x, (0, 2, 1, 3)).reshape(B, 32, 3 * 32).astype(jnp.bfloat16)
    r1 = conv_relu_pool(xr, params["conv1_w"], params["conv1_b"])   # (B, 14, 6*14)
    r2 = conv_relu_pool(r1, params["conv2_w"], params["conv2_b"])   # (B, 5, 16*5)
    # NCHW flatten order (c, h, w), matching x.view(-1, 16*5*5) in PyTorch.
    flat = jnp.transpose(r2.reshape(B, 5, 16, 5), (0, 2, 1, 3)).reshape(B, 16 * 5 * 5)
    # nn.Dropout(0.25) is constructed but never applied in the reference
    # forward(), so there is intentionally no dropout here.
    return fc_head(flat,
                   params["fc1_w"], params["fc1_b"],
                   params["fc2_w"], params["fc2_b"],
                   params["fc3_w"], params["fc3_b"])                # (B, 10) f32


if __name__ == "__main__":
    key = jax.random.PRNGKey(0)
    pkey, xkey = jax.random.split(key)
    params = init_params(pkey)
    x = jax.random.normal(xkey, (2, 3, 32, 32), jnp.float32)

    out = net_forward(params, x)
    out = jax.block_until_ready(out)
    assert out.shape == (2, 10), out.shape
    print("KERNEL_OK")
</pallas_src>

<mosaic_0001>
module attributes {stable_mosaic.version = 11 : i64} {
  func.func @_conv_pool_kernel(%arg0: i32, %arg1: memref<6x16x96xbf16, #tpu.memory_space<vmem>>, %arg2: memref<2x5x96x128xbf16, #tpu.memory_space<vmem>>, %arg3: memref<1x128xf32, #tpu.memory_space<vmem>>, %arg4: memref<16x128xbf16, #tpu.memory_space<vmem>>) attributes {dimension_semantics = [#tpu.dimension_semantics<parallel>], iteration_bounds = array<i64: 2>, scalar_prefetch = 0 : i64, scratch_operands = 0 : i64, tpu.core_type = #tpu.core_type<tc>, window_params = [{transform_indices = @transform_0, window_bounds = array<i64: 6, 16, 96>}, {pipeline_mode = #tpu.pipeline_mode<synchronous>, transform_indices = @transform_1, window_bounds = array<i64: 2, 5, 96, 128>}, {pipeline_mode = #tpu.pipeline_mode<synchronous>, transform_indices = @transform_2, window_bounds = array<i64: 1, 128>}, {transform_indices = @transform_3, window_bounds = array<i64: 16, 128>}]} {
    %c0 = arith.constant 0 : index
    %c0_0 = arith.constant 0 : index
    %c0_1 = arith.constant 0 : index
    %0 = vector.load %arg1[%c0, %c0_0, %c0_1] : memref<6x16x96xbf16, #tpu.memory_space<vmem>>, vector<1x16x96xbf16>
    %1 = vector.shape_cast %0 : vector<1x16x96xbf16> to vector<16x96xbf16>
    %c0_2 = arith.constant 0 : index
    %c0_3 = arith.constant 0 : index
    %c0_4 = arith.constant 0 : index
    %c0_5 = arith.constant 0 : index
    %2 = vector.load %arg2[%c0_2, %c0_3, %c0_4, %c0_5] : memref<2x5x96x128xbf16, #tpu.memory_space<vmem>>, vector<1x1x96x128xbf16>
    %3 = vector.shape_cast %2 : vector<1x1x96x128xbf16> to vector<96x128xbf16>
    %cst = arith.constant dense<0.000000e+00> : vector<16x128xf32>
    %4 = tpu.matmul %1, %3, %cst {dimension_numbers = #tpu.dot_dimension_numbers<[1], [0], [0], [1], [0, 0, 1, 1], [], []>} : vector<16x96xbf16>, vector<96x128xbf16>, vector<16x128xf32> -> vector<16x128xf32>
    %c1 = arith.constant 1 : index
    %c0_6 = arith.constant 0 : index
    %c0_7 = arith.constant 0 : index
    %5 = vector.load %arg1[%c1, %c0_6, %c0_7] : memref<6x16x96xbf16, #tpu.memory_space<vmem>>, vector<1x16x96xbf16>
    %6 = vector.shape_cast %5 : vector<1x16x96xbf16> to vector<16x96xbf16>
    %c0_8 = arith.constant 0 : index
    %c1_9 = arith.constant 1 : index
    %c0_10 = arith.constant 0 : index
    %c0_11 = arith.constant 0 : index
    %7 = vector.load %arg2[%c0_8, %c1_9, %c0_10, %c0_11] : memref<2x5x96x128xbf16, #tpu.memory_space<vmem>>, vector<1x1x96x128xbf16>
    %8 = vector.shape_cast %7 : vector<1x1x96x128xbf16> to vector<96x128xbf16>
    %cst_12 = arith.constant dense<0.000000e+00> : vector<16x128xf32>
    %9 = tpu.matmul %6, %8, %cst_12 {dimension_numbers = #tpu.dot_dimension_numbers<[1], [0], [0], [1], [0, 0, 1, 1], [], []>} : vector<16x96xbf16>, vector<96x128xbf16>, vector<16x128xf32> -> vector<16x128xf32>
    %10 = arith.addf %4, %9 : vector<16x128xf32>
    %c2 = arith.constant 2 : index
    %c0_13 = arith.constant 0 : index
    %c0_14 = arith.constant 0 : index
    %11 = vector.load %arg1[%c2, %c0_13, %c0_14] : memref<6x16x96xbf16, #tpu.memory_space<vmem>>, vector<1x16x96xbf16>
    %12 = vector.shape_cast %11 : vector<1x16x96xbf16> to vector<16x96xbf16>
    %c0_15 = arith.constant 0 : index
    %c2_16 = arith.constant 2 : index
    %c0_17 = arith.constant 0 : index
    %c0_18 = arith.constant 0 : index
    %13 = vector.load %arg2[%c0_15, %c2_16, %c0_17, %c0_18] : memref<2x5x96x128xbf16, #tpu.memory_space<vmem>>, vector<1x1x96x128xbf16>
    %14 = vector.shape_cast %13 : vector<1x1x96x128xbf16> to vector<96x128xbf16>
    %cst_19 = arith.constant dense<0.000000e+00> : vector<16x128xf32>
    %15 = tpu.matmul %12, %14, %cst_19 {dimension_numbers = #tpu.dot_dimension_numbers<[1], [0], [0], [1], [0, 0, 1, 1], [], []>} : vector<16x96xbf16>, vector<96x128xbf16>, vector<16x128xf32> -> vector<16x128xf32>
    %16 = arith.addf %10, %15 : vector<16x128xf32>
    %c3 = arith.constant 3 : index
    %c0_20 = arith.constant 0 : index
    %c0_21 = arith.constant 0 : index
    %17 = vector.load %arg1[%c3, %c0_20, %c0_21] : memref<6x16x96xbf16, #tpu.memory_space<vmem>>, vector<1x16x96xbf16>
    %18 = vector.shape_cast %17 : vector<1x16x96xbf16> to vector<16x96xbf16>
    %c0_22 = arith.constant 0 : index
    %c3_23 = arith.constant 3 : index
    %c0_24 = arith.constant 0 : index
    %c0_25 = arith.constant 0 : index
    %19 = vector.load %arg2[%c0_22, %c3_23, %c0_24, %c0_25] : memref<2x5x96x128xbf16, #tpu.memory_space<vmem>>, vector<1x1x96x128xbf16>
    %20 = vector.shape_cast %19 : vector<1x1x96x128xbf16> to vector<96x128xbf16>
    %cst_26 = arith.constant dense<0.000000e+00> : vector<16x128xf32>
    %21 = tpu.matmul %18, %20, %cst_26 {dimension_numbers = #tpu.dot_dimension_numbers<[1], [0], [0], [1], [0, 0, 1, 1], [], []>} : vector<16x96xbf16>, vector<96x128xbf16>, vector<16x128xf32> -> vector<16x128xf32>
    %22 = arith.addf %16, %21 : vector<16x128xf32>
    %c4 = arith.constant 4 : index
    %c0_27 = arith.constant 0 : index
    %c0_28 = arith.constant 0 : index
    %23 = vector.load %arg1[%c4, %c0_27, %c0_28] : memref<6x16x96xbf16, #tpu.memory_space<vmem>>, vector<1x16x96xbf16>
    %24 = vector.shape_cast %23 : vector<1x16x96xbf16> to vector<16x96xbf16>
    %c0_29 = arith.constant 0 : index
    %c4_30 = arith.constant 4 : index
    %c0_31 = arith.constant 0 : index
    %c0_32 = arith.constant 0 : index
    %25 = vector.load %arg2[%c0_29, %c4_30, %c0_31, %c0_32] : memref<2x5x96x128xbf16, #tpu.memory_space<vmem>>, vector<1x1x96x128xbf16>
    %26 = vector.shape_cast %25 : vector<1x1x96x128xbf16> to vector<96x128xbf16>
    %cst_33 = arith.constant dense<0.000000e+00> : vector<16x128xf32>
    %27 = tpu.matmul %24, %26, %cst_33 {dimension_numbers = #tpu.dot_dimension_numbers<[1], [0], [0], [1], [0, 0, 1, 1], [], []>} : vector<16x96xbf16>, vector<96x128xbf16>, vector<16x128xf32> -> vector<16x128xf32>
    %28 = arith.addf %22, %27 : vector<16x128xf32>
    %c0_34 = arith.constant 0 : index
    %c0_35 = arith.constant 0 : index
    %c0_36 = arith.constant 0 : index
    %29 = vector.load %arg1[%c0_34, %c0_35, %c0_36] : memref<6x16x96xbf16, #tpu.memory_space<vmem>>, vector<1x16x96xbf16>
    %30 = vector.shape_cast %29 : vector<1x16x96xbf16> to vector<16x96xbf16>
    %c1_37 = arith.constant 1 : index
    %c0_38 = arith.constant 0 : index
    %c0_39 = arith.constant 0 : index
    %c0_40 = arith.constant 0 : index
    %31 = vector.load %arg2[%c1_37, %c0_38, %c0_39, %c0_40] : memref<2x5x96x128xbf16, #tpu.memory_space<vmem>>, vector<1x1x96x128xbf16>
    %32 = vector.shape_cast %31 : vector<1x1x96x128xbf16> to vector<96x128xbf16>
    %cst_41 = arith.constant dense<0.000000e+00> : vector<16x128xf32>
    %33 = tpu.matmul %30, %32, %cst_41 {dimension_numbers = #tpu.dot_dimension_numbers<[1], [0], [0], [1], [0, 0, 1, 1], [], []>} : vector<16x96xbf16>, vector<96x128xbf16>, vector<16x128xf32> -> vector<16x128xf32>
    %c1_42 = arith.constant 1 : index
    %c0_43 = arith.constant 0 : index
    %c0_44 = arith.constant 0 : index
    %34 = vector.load %arg1[%c1_42, %c0_43, %c0_44] : memref<6x16x96xbf16, #tpu.memory_space<vmem>>, vector<1x16x96xbf16>
    %35 = vector.shape_cast %34 : vector<1x16x96xbf16> to vector<16x96xbf16>
    %c1_45 = arith.constant 1 : index
    %c1_46 = arith.constant 1 : index
    %c0_47 = arith.constant 0 : index
    %c0_48 = arith.constant 0 : index
    %36 = vector.load %arg2[%c1_45, %c1_46, %c0_47, %c0_48] : memref<2x5x96x128xbf16, #tpu.memory_space<vmem>>, vector<1x1x96x128xbf16>
    %37 = vector.shape_cast %36 : vector<1x1x96x128xbf16> to vector<96x128xbf16>
    %cst_49 = arith.constant dense<0.000000e+00> : vector<16x128xf32>
    %38 = tpu.matmul %35, %37, %cst_49 {dimension_numbers = #tpu.dot_dimension_numbers<[1], [0], [0], [1], [0, 0, 1, 1], [], []>} : vector<16x96xbf16>, vector<96x128xbf16>, vector<16x128xf32> -> vector<16x128xf32>
    %39 = arith.addf %33, %38 : vector<16x128xf32>
    %c2_50 = arith.constant 2 : index
    %c0_51 = arith.constant 0 : index
    %c0_52 = arith.constant 0 : index
    %40 = vector.load %arg1[%c2_50, %c0_51, %c0_52] : memref<6x16x96xbf16, #tpu.memory_space<vmem>>, vector<1x16x96xbf16>
    %41 = vector.shape_cast %40 : vector<1x16x96xbf16> to vector<16x96xbf16>
    %c1_53 = arith.constant 1 : index
    %c2_54 = arith.constant 2 : index
    %c0_55 = arith.constant 0 : index
    %c0_56 = arith.constant 0 : index
    %42 = vector.load %arg2[%c1_53, %c2_54, %c0_55, %c0_56] : memref<2x5x96x128xbf16, #tpu.memory_space<vmem>>, vector<1x1x96x128xbf16>
    %43 = vector.shape_cast %42 : vector<1x1x96x128xbf16> to vector<96x128xbf16>
    %cst_57 = arith.constant dense<0.000000e+00> : vector<16x128xf32>
    %44 = tpu.matmul %41, %43, %cst_57 {dimension_numbers = #tpu.dot_dimension_numbers<[1], [0], [0], [1], [0, 0, 1, 1], [], []>} : vector<16x96xbf16>, vector<96x128xbf16>, vector<16x128xf32> -> vector<16x128xf32>
    %45 = arith.addf %39, %44 : vector<16x128xf32>
    %c3_58 = arith.constant 3 : index
    %c0_59 = arith.constant 0 : index
    %c0_60 = arith.constant 0 : index
    %46 = vector.load %arg1[%c3_58, %c0_59, %c0_60] : memref<6x16x96xbf16, #tpu.memory_space<vmem>>, vector<1x16x96xbf16>
    %47 = vector.shape_cast %46 : vector<1x16x96xbf16> to vector<16x96xbf16>
    %c1_61 = arith.constant 1 : index
    %c3_62 = arith.constant 3 : index
    %c0_63 = arith.constant 0 : index
    %c0_64 = arith.constant 0 : index
    %48 = vector.load %arg2[%c1_61, %c3_62, %c0_63, %c0_64] : memref<2x5x96x128xbf16, #tpu.memory_space<vmem>>, vector<1x1x96x128xbf16>
    %49 = vector.shape_cast %48 : vector<1x1x96x128xbf16> to vector<96x128xbf16>
    %cst_65 = arith.constant dense<0.000000e+00> : vector<16x128xf32>
    %50 = tpu.matmul %47, %49, %cst_65 {dimension_numbers = #tpu.dot_dimension_numbers<[1], [0], [0], [1], [0, 0, 1, 1], [], []>} : vector<16x96xbf16>, vector<96x128xbf16>, vector<16x128xf32> -> vector<16x128xf32>
    %51 = arith.addf %45, %50 : vector<16x128xf32>
    %c4_66 = arith.constant 4 : index
    %c0_67 = arith.constant 0 : index
    %c0_68 = arith.constant 0 : index
    %52 = vector.load %arg1[%c4_66, %c0_67, %c0_68] : memref<6x16x96xbf16, #tpu.memory_space<vmem>>, vector<1x16x96xbf16>
    %53 = vector.shape_cast %52 : vector<1x16x96xbf16> to vector<16x96xbf16>
    %c1_69 = arith.constant 1 : index
    %c4_70 = arith.constant 4 : index
    %c0_71 = arith.constant 0 : index
    %c0_72 = arith.constant 0 : index
    %54 = vector.load %arg2[%c1_69, %c4_70, %c0_71, %c0_72] : memref<2x5x96x128xbf16, #tpu.memory_space<vmem>>, vector<1x1x96x128xbf16>
    %55 = vector.shape_cast %54 : vector<1x1x96x128xbf16> to vector<96x128xbf16>
    %cst_73 = arith.constant dense<0.000000e+00> : vector<16x128xf32>
    %56 = tpu.matmul %53, %55, %cst_73 {dimension_numbers = #tpu.dot_dimension_numbers<[1], [0], [0], [1], [0, 0, 1, 1], [], []>} : vector<16x96xbf16>, vector<96x128xbf16>, vector<16x128xf32> -> vector<16x128xf32>
    %57 = arith.addf %51, %56 : vector<16x128xf32>
    %58 = arith.maximumf %28, %57 : vector<16x128xf32>
    %c1_74 = arith.constant 1 : index
    %c0_75 = arith.constant 0 : index
    %c0_76 = arith.constant 0 : index
    %59 = vector.load %arg1[%c1_74, %c0_75, %c0_76] : memref<6x16x96xbf16, #tpu.memory_space<vmem>>, vector<1x16x96xbf16>
    %60 = vector.shape_cast %59 : vector<1x16x96xbf16> to vector<16x96xbf16>
    %c0_77 = arith.constant 0 : index
    %c0_78 = arith.constant 0 : index
    %c0_79 = arith.constant 0 : index
    %c0_80 = arith.constant 0 : index
    %61 = vector.load %arg2[%c0_77, %c0_78, %c0_79, %c0_80] : memref<2x5x96x128xbf16, #tpu.memory_space<vmem>>, vector<1x1x96x128xbf16>
    %62 = vector.shape_cast %61 : vector<1x1x96x128xbf16> to vector<96x128xbf16>
    %cst_81 = arith.constant dense<0.000000e+00> : vector<16x128xf32>
    %63 = tpu.matmul %60, %62, %cst_81 {dimension_numbers = #tpu.dot_dimension_numbers<[1], [0], [0], [1], [0, 0, 1, 1], [], []>} : vector<16x96xbf16>, vector<96x128xbf16>, vector<16x128xf32> -> vector<16x128xf32>
    %c2_82 = arith.constant 2 : index
    %c0_83 = arith.constant 0 : index
    %c0_84 = arith.constant 0 : index
    %64 = vector.load %arg1[%c2_82, %c0_83, %c0_84] : memref<6x16x96xbf16, #tpu.memory_space<vmem>>, vector<1x16x96xbf16>
    %65 = vector.shape_cast %64 : vector<1x16x96xbf16> to vector<16x96xbf16>
    %c0_85 = arith.constant 0 : index
    %c1_86 = arith.constant 1 : index
    %c0_87 = arith.constant 0 : index
    %c0_88 = arith.constant 0 : index
    %66 = vector.load %arg2[%c0_85, %c1_86, %c0_87, %c0_88] : memref<2x5x96x128xbf16, #tpu.memory_space<vmem>>, vector<1x1x96x128xbf16>
    %67 = vector.shape_cast %66 : vector<1x1x96x128xbf16> to vector<96x128xbf16>
    %cst_89 = arith.constant dense<0.000000e+00> : vector<16x128xf32>
    %68 = tpu.matmul %65, %67, %cst_89 {dimension_numbers = #tpu.dot_dimension_numbers<[1], [0], [0], [1], [0, 0, 1, 1], [], []>} : vector<16x96xbf16>, vector<96x128xbf16>, vector<16x128xf32> -> vector<16x128xf32>
    %69 = arith.addf %63, %68 : vector<16x128xf32>
    %c3_90 = arith.constant 3 : index
    %c0_91 = arith.constant 0 : index
    %c0_92 = arith.constant 0 : index
    %70 = vector.load %arg1[%c3_90, %c0_91, %c0_92] : memref<6x16x96xbf16, #tpu.memory_space<vmem>>, vector<1x16x96xbf16>
    %71 = vector.shape_cast %70 : vector<1x16x96xbf16> to vector<16x96xbf16>
    %c0_93 = arith.constant 0 : index
    %c2_94 = arith.constant 2 : index
    %c0_95 = arith.constant 0 : index
    %c0_96 = arith.constant 0 : index
    %72 = vector.load %arg2[%c0_93, %c2_94, %c0_95, %c0_96] : memref<2x5x96x128xbf16, #tpu.memory_space<vmem>>, vector<1x1x96x128xbf16>
    %73 = vector.shape_cast %72 : vector<1x1x96x128xbf16> to vector<96x128xbf16>
    %cst_97 = arith.constant dense<0.000000e+00> : vector<16x128xf32>
    %74 = tpu.matmul %71, %73, %cst_97 {dimension_numbers = #tpu.dot_dimension_numbers<[1], [0], [0], [1], [0, 0, 1, 1], [], []>} : vector<16x96xbf16>, vector<96x128xbf16>, vector<16x128xf32> -> vector<16x128xf32>
    %75 = arith.addf %69, %74 : vector<16x128xf32>
    %c4_98 = arith.constant 4 : index
    %c0_99 = arith.constant 0 : index
    %c0_100 = arith.constant 0 : index
    %76 = vector.load %arg1[%c4_98, %c0_99, %c0_100] : memref<6x16x96xbf16, #tpu.memory_space<vmem>>, vector<1x16x96xbf16>
    %77 = vector.shape_cast %76 : vector<1x16x96xbf16> to vector<16x96xbf16>
    %c0_101 = arith.constant 0 : index
    %c3_102 = arith.constant 3 : index
    %c0_103 = arith.constant 0 : index
    %c0_104 = arith.constant 0 : index
    %78 = vector.load %arg2[%c0_101, %c3_102, %c0_103, %c0_104] : memref<2x5x96x128xbf16, #tpu.memory_space<vmem>>, vector<1x1x96x128xbf16>
    %79 = vector.shape_cast %78 : vector<1x1x96x128xbf16> to vector<96x128xbf16>
    %cst_105 = arith.constant dense<0.000000e+00> : vector<16x128xf32>
    %80 = tpu.matmul %77, %79, %cst_105 {dimension_numbers = #tpu.dot_dimension_numbers<[1], [0], [0], [1], [0, 0, 1, 1], [], []>} : vector<16x96xbf16>, vector<96x128xbf16>, vector<16x128xf32> -> vector<16x128xf32>
    %81 = arith.addf %75, %80 : vector<16x128xf32>
    %c5 = arith.constant 5 : index
    %c0_106 = arith.constant 0 : index
    %c0_107 = arith.constant 0 : index
    %82 = vector.load %arg1[%c5, %c0_106, %c0_107] : memref<6x16x96xbf16, #tpu.memory_space<vmem>>, vector<1x16x96xbf16>
    %83 = vector.shape_cast %82 : vector<1x16x96xbf16> to vector<16x96xbf16>
    %c0_108 = arith.constant 0 : index
    %c4_109 = arith.constant 4 : index
    %c0_110 = arith.constant 0 : index
    %c0_111 = arith.constant 0 : index
    %84 = vector.load %arg2[%c0_108, %c4_109, %c0_110, %c0_111] : memref<2x5x96x128xbf16, #tpu.memory_space<vmem>>, vector<1x1x96x128xbf16>
    %85 = vector.shape_cast %84 : vector<1x1x96x128xbf16> to vector<96x128xbf16>
    %cst_112 = arith.constant dense<0.000000e+00> : vector<16x128xf32>
    %86 = tpu.matmul %83, %85, %cst_112 {dimension_numbers = #tpu.dot_dimension_numbers<[1], [0], [0], [1], [0, 0, 1, 1], [], []>} : vector<16x96xbf16>, vector<96x128xbf16>, vector<16x128xf32> -> vector<16x128xf32>
    %87 = arith.addf %81, %86 : vector<16x128xf32>
    %88 = arith.maximumf %58, %87 : vector<16x128xf32>
    %c1_113 = arith.constant 1 : index
    %c0_114 = arith.constant 0 : index
    %c0_115 = arith.constant 0 : index
    %89 = vector.load %arg1[%c1_113, %c0_114, %c0_115] : memref<6x16x96xbf16, #tpu.memory_space<vmem>>, vector<1x16x96xbf16>
    %90 = vector.shape_cast %89 : vector<1x16x96xbf16> to vector<16x96xbf16>
    %c1_116 = arith.constant 1 : index
    %c0_117 = arith.constant 0 : index
    %c0_118 = arith.constant 0 : index
    %c0_119 = arith.constant 0 : index
    %91 = vector.load %arg2[%c1_116, %c0_117, %c0_118, %c0_119] : memref<2x5x96x128xbf16, #tpu.memory_space<vmem>>, vector<1x1x96x128xbf16>
    %92 = vector.shape_cast %91 : vector<1x1x96x128xbf16> to vector<96x128xbf16>
    %cst_120 = arith.constant dense<0.000000e+00> : vector<16x128xf32>
    %93 = tpu.matmul %90, %92, %cst_120 {dimension_numbers = #tpu.dot_dimension_numbers<[1], [0], [0], [1], [0, 0, 1, 1], [], []>} : vector<16x96xbf16>, vector<96x128xbf16>, vector<16x128xf32> -> vector<16x128xf32>
    %c2_121 = arith.constant 2 : index
    %c0_122 = arith.constant 0 : index
    %c0_123 = arith.constant 0 : index
    %94 = vector.load %arg1[%c2_121, %c0_122, %c0_123] : memref<6x16x96xbf16, #tpu.memory_space<vmem>>, vector<1x16x96xbf16>
    %95 = vector.shape_cast %94 : vector<1x16x96xbf16> to vector<16x96xbf16>
    %c1_124 = arith.constant 1 : index
    %c1_125 = arith.constant 1 : index
    %c0_126 = arith.constant 0 : index
    %c0_127 = arith.constant 0 : index
    %96 = vector.load %arg2[%c1_124, %c1_125, %c0_126, %c0_127] : memref<2x5x96x128xbf16, #tpu.memory_space<vmem>>, vector<1x1x96x128xbf16>
    %97 = vector.shape_cast %96 : vector<1x1x96x128xbf16> to vector<96x128xbf16>
    %cst_128 = arith.constant dense<0.000000e+00> : vector<16x128xf32>
    %98 = tpu.matmul %95, %97, %cst_128 {dimension_numbers = #tpu.dot_dimension_numbers<[1], [0], [0], [1], [0, 0, 1, 1], [], []>} : vector<16x96xbf16>, vector<96x128xbf16>, vector<16x128xf32> -> vector<16x128xf32>
    %99 = arith.addf %93, %98 : vector<16x128xf32>
    %c3_129 = arith.constant 3 : index
    %c0_130 = arith.constant 0 : index
    %c0_131 = arith.constant 0 : index
    %100 = vector.load %arg1[%c3_129, %c0_130, %c0_131] : memref<6x16x96xbf16, #tpu.memory_space<vmem>>, vector<1x16x96xbf16>
    %101 = vector.shape_cast %100 : vector<1x16x96xbf16> to vector<16x96xbf16>
    %c1_132 = arith.constant 1 : index
    %c2_133 = arith.constant 2 : index
    %c0_134 = arith.constant 0 : index
    %c0_135 = arith.constant 0 : index
    %102 = vector.load %arg2[%c1_132, %c2_133, %c0_134, %c0_135] : memref<2x5x96x128xbf16, #tpu.memory_space<vmem>>, vector<1x1x96x128xbf16>
    %103 = vector.shape_cast %102 : vector<1x1x96x128xbf16> to vector<96x128xbf16>
    %cst_136 = arith.constant dense<0.000000e+00> : vector<16x128xf32>
    %104 = tpu.matmul %101, %103, %cst_136 {dimension_numbers = #tpu.dot_dimension_numbers<[1], [0], [0], [1], [0, 0, 1, 1], [], []>} : vector<16x96xbf16>, vector<96x128xbf16>, vector<16x128xf32> -> vector<16x128xf32>
    %105 = arith.addf %99, %104 : vector<16x128xf32>
    %c4_137 = arith.constant 4 : index
    %c0_138 = arith.constant 0 : index
    %c0_139 = arith.constant 0 : index
    %106 = vector.load %arg1[%c4_137, %c0_138, %c0_139] : memref<6x16x96xbf16, #tpu.memory_space<vmem>>, vector<1x16x96xbf16>
    %107 = vector.shape_cast %106 : vector<1x16x96xbf16> to vector<16x96xbf16>
    %c1_140 = arith.constant 1 : index
    %c3_141 = arith.constant 3 : index
    %c0_142 = arith.constant 0 : index
    %c0_143 = arith.constant 0 : index
    %108 = vector.load %arg2[%c1_140, %c3_141, %c0_142, %c0_143] : memref<2x5x96x128xbf16, #tpu.memory_space<vmem>>, vector<1x1x96x128xbf16>
    %109 = vector.shape_cast %108 : vector<1x1x96x128xbf16> to vector<96x128xbf16>
    %cst_144 = arith.constant dense<0.000000e+00> : vector<16x128xf32>
    %110 = tpu.matmul %107, %109, %cst_144 {dimension_numbers = #tpu.dot_dimension_numbers<[1], [0], [0], [1], [0, 0, 1, 1], [], []>} : vector<16x96xbf16>, vector<96x128xbf16>, vector<16x128xf32> -> vector<16x128xf32>
    %111 = arith.addf %105, %110 : vector<16x128xf32>
    %c5_145 = arith.constant 5 : index
    %c0_146 = arith.constant 0 : index
    %c0_147 = arith.constant 0 : index
    %112 = vector.load %arg1[%c5_145, %c0_146, %c0_147] : memref<6x16x96xbf16, #tpu.memory_space<vmem>>, vector<1x16x96xbf16>
    %113 = vector.shape_cast %112 : vector<1x16x96xbf16> to vector<16x96xbf16>
    %c1_148 = arith.constant 1 : index
    %c4_149 = arith.constant 4 : index
    %c0_150 = arith.constant 0 : index
    %c0_151 = arith.constant 0 : index
    %114 = vector.load %arg2[%c1_148, %c4_149, %c0_150, %c0_151] : memref<2x5x96x128xbf16, #tpu.memory_space<vmem>>, vector<1x1x96x128xbf16>
    %115 = vector.shape_cast %114 : vector<1x1x96x128xbf16> to vector<96x128xbf16>
    %cst_152 = arith.constant dense<0.000000e+00> : vector<16x128xf32>
    %116 = tpu.matmul %113, %115, %cst_152 {dimension_numbers = #tpu.dot_dimension_numbers<[1], [0], [0], [1], [0, 0, 1, 1], [], []>} : vector<16x96xbf16>, vector<96x128xbf16>, vector<16x128xf32> -> vector<16x128xf32>
    %117 = arith.addf %111, %116 : vector<16x128xf32>
    %118 = arith.maximumf %88, %117 : vector<16x128xf32>
    %c0_153 = arith.constant 0 : index
    %c0_154 = arith.constant 0 : index
    %119 = vector.load %arg3[%c0_153, %c0_154] : memref<1x128xf32, #tpu.memory_space<vmem>>, vector<1x128xf32>
    %120 = vector.broadcast %119 : vector<1x128xf32> to vector<16x128xf32>
    %121 = arith.addf %118, %120 : vector<16x128xf32>
    %cst_155 = arith.constant 0.000000e+00 : f32
    %122 = vector.broadcast %cst_155 : f32 to vector<16x128xf32>
    %123 = arith.maximumf %121, %122 : vector<16x128xf32>
    %124 = arith.truncf %123 : vector<16x128xf32> to vector<16x128xbf16>
    %c0_156 = arith.constant 0 : index
    %c0_157 = arith.constant 0 : index
    %125 = vector.load %arg4[%c0_156, %c0_157] : memref<16x128xbf16, #tpu.memory_space<vmem>>, vector<16x128xbf16>
    tpu.vector_store %arg4[%c0_156, %c0_157], %124 {strides = array<i32>} : memref<16x128xbf16, #tpu.memory_space<vmem>>, vector<16x128xbf16>,
    return
  }
  func.func @transform_0(%arg0: i32) -> (i32, i32, i32) {
    %c0_i32 = arith.constant 0 : i32
    %c0_i32_0 = arith.constant 0 : i32
    %c0_i32_1 = arith.constant 0 : i32
    return %c0_i32, %arg0, %c0_i32_0 : i32, i32, i32
  }
  func.func @transform_1(%arg0: i32) -> (i32, i32, i32, i32) {
    %c0_i32 = arith.constant 0 : i32
    %c0_i32_0 = arith.constant 0 : i32
    %c0_i32_1 = arith.constant 0 : i32
    %c0_i32_2 = arith.constant 0 : i32
    %c0_i32_3 = arith.constant 0 : i32
    return %c0_i32, %c0_i32_0, %c0_i32_1, %c0_i32_2 : i32, i32, i32, i32
  }
  func.func @transform_2(%arg0: i32) -> (i32, i32) {
    %c0_i32 = arith.constant 0 : i32
    %c0_i32_0 = arith.constant 0 : i32
    %c0_i32_1 = arith.constant 0 : i32
    return %c0_i32, %c0_i32_0 : i32, i32
  }
  func.func @transform_3(%arg0: i32) -> (i32, i32) {
    %c0_i32 = arith.constant 0 : i32
    %c0_i32_0 = arith.constant 0 : i32
    return %arg0, %c0_i32 : i32, i32
  }
}

module attributes {stable_mosaic.version = 11 : i64} {
  func.func @_conv_pool_kernel(%arg0: i32, %arg1: memref<6x8x84xbf16, #tpu.memory_space<vmem>>, %arg2: memref<2x5x84x128xbf16, #tpu.memory_space<vmem>>, %arg3: memref<1x128xf32, #tpu.memory_space<vmem>>, %arg4: memref<8x128xbf16, #tpu.memory_space<vmem>>) attributes {dimension_semantics = [#tpu.dimension_semantics<parallel>], iteration_bounds = array<i64: 2>, scalar_prefetch = 0 : i64, scratch_operands = 0 : i64, tpu.core_type = #tpu.core_type<tc>, window_params = [{transform_indices = @transform_0, window_bounds = array<i64: 6, 8, 84>}, {pipeline_mode = #tpu.pipeline_mode<synchronous>, transform_indices = @transform_1, window_bounds = array<i64: 2, 5, 84, 128>}, {pipeline_mode = #tpu.pipeline_mode<synchronous>, transform_indices = @transform_2, window_bounds = array<i64: 1, 128>}, {transform_indices = @transform_3, window_bounds = array<i64: 8, 128>}]} {
    %c0 = arith.constant 0 : index
    %c0_0 = arith.constant 0 : index
    %c0_1 = arith.constant 0 : index
    %0 = vector.load %arg1[%c0, %c0_0, %c0_1] : memref<6x8x84xbf16, #tpu.memory_space<vmem>>, vector<1x8x84xbf16>
    %1 = vector.shape_cast %0 : vector<1x8x84xbf16> to vector<8x84xbf16>
    %c0_2 = arith.constant 0 : index
    %c0_3 = arith.constant 0 : index
    %c0_4 = arith.constant 0 : index
    %c0_5 = arith.constant 0 : index
    %2 = vector.load %arg2[%c0_2, %c0_3, %c0_4, %c0_5] : memref<2x5x84x128xbf16, #tpu.memory_space<vmem>>, vector<1x1x84x128xbf16>
    %3 = vector.shape_cast %2 : vector<1x1x84x128xbf16> to vector<84x128xbf16>
    %cst = arith.constant dense<0.000000e+00> : vector<8x128xf32>
    %4 = tpu.matmul %1, %3, %cst {dimension_numbers = #tpu.dot_dimension_numbers<[1], [0], [0], [1], [0, 0, 1, 1], [], []>} : vector<8x84xbf16>, vector<84x128xbf16>, vector<8x128xf32> -> vector<8x128xf32>
    %c1 = arith.constant 1 : index
    %c0_6 = arith.constant 0 : index
    %c0_7 = arith.constant 0 : index
    %5 = vector.load %arg1[%c1, %c0_6, %c0_7] : memref<6x8x84xbf16, #tpu.memory_space<vmem>>, vector<1x8x84xbf16>
    %6 = vector.shape_cast %5 : vector<1x8x84xbf16> to vector<8x84xbf16>
    %c0_8 = arith.constant 0 : index
    %c1_9 = arith.constant 1 : index
    %c0_10 = arith.constant 0 : index
    %c0_11 = arith.constant 0 : index
    %7 = vector.load %arg2[%c0_8, %c1_9, %c0_10, %c0_11] : memref<2x5x84x128xbf16, #tpu.memory_space<vmem>>, vector<1x1x84x128xbf16>
    %8 = vector.shape_cast %7 : vector<1x1x84x128xbf16> to vector<84x128xbf16>
    %cst_12 = arith.constant dense<0.000000e+00> : vector<8x128xf32>
    %9 = tpu.matmul %6, %8, %cst_12 {dimension_numbers = #tpu.dot_dimension_numbers<[1], [0], [0], [1], [0, 0, 1, 1], [], []>} : vector<8x84xbf16>, vector<84x128xbf16>, vector<8x128xf32> -> vector<8x128xf32>
    %10 = arith.addf %4, %9 : vector<8x128xf32>
    %c2 = arith.constant 2 : index
    %c0_13 = arith.constant 0 : index
    %c0_14 = arith.constant 0 : index
    %11 = vector.load %arg1[%c2, %c0_13, %c0_14] : memref<6x8x84xbf16, #tpu.memory_space<vmem>>, vector<1x8x84xbf16>
    %12 = vector.shape_cast %11 : vector<1x8x84xbf16> to vector<8x84xbf16>
    %c0_15 = arith.constant 0 : index
    %c2_16 = arith.constant 2 : index
    %c0_17 = arith.constant 0 : index
    %c0_18 = arith.constant 0 : index
    %13 = vector.load %arg2[%c0_15, %c2_16, %c0_17, %c0_18] : memref<2x5x84x128xbf16, #tpu.memory_space<vmem>>, vector<1x1x84x128xbf16>
    %14 = vector.shape_cast %13 : vector<1x1x84x128xbf16> to vector<84x128xbf16>
    %cst_19 = arith.constant dense<0.000000e+00> : vector<8x128xf32>
    %15 = tpu.matmul %12, %14, %cst_19 {dimension_numbers = #tpu.dot_dimension_numbers<[1], [0], [0], [1], [0, 0, 1, 1], [], []>} : vector<8x84xbf16>, vector<84x128xbf16>, vector<8x128xf32> -> vector<8x128xf32>
    %16 = arith.addf %10, %15 : vector<8x128xf32>
    %c3 = arith.constant 3 : index
    %c0_20 = arith.constant 0 : index
    %c0_21 = arith.constant 0 : index
    %17 = vector.load %arg1[%c3, %c0_20, %c0_21] : memref<6x8x84xbf16, #tpu.memory_space<vmem>>, vector<1x8x84xbf16>
    %18 = vector.shape_cast %17 : vector<1x8x84xbf16> to vector<8x84xbf16>
    %c0_22 = arith.constant 0 : index
    %c3_23 = arith.constant 3 : index
    %c0_24 = arith.constant 0 : index
    %c0_25 = arith.constant 0 : index
    %19 = vector.load %arg2[%c0_22, %c3_23, %c0_24, %c0_25] : memref<2x5x84x128xbf16, #tpu.memory_space<vmem>>, vector<1x1x84x128xbf16>
    %20 = vector.shape_cast %19 : vector<1x1x84x128xbf16> to vector<84x128xbf16>
    %cst_26 = arith.constant dense<0.000000e+00> : vector<8x128xf32>
    %21 = tpu.matmul %18, %20, %cst_26 {dimension_numbers = #tpu.dot_dimension_numbers<[1], [0], [0], [1], [0, 0, 1, 1], [], []>} : vector<8x84xbf16>, vector<84x128xbf16>, vector<8x128xf32> -> vector<8x128xf32>
    %22 = arith.addf %16, %21 : vector<8x128xf32>
    %c4 = arith.constant 4 : index
    %c0_27 = arith.constant 0 : index
    %c0_28 = arith.constant 0 : index
    %23 = vector.load %arg1[%c4, %c0_27, %c0_28] : memref<6x8x84xbf16, #tpu.memory_space<vmem>>, vector<1x8x84xbf16>
    %24 = vector.shape_cast %23 : vector<1x8x84xbf16> to vector<8x84xbf16>
    %c0_29 = arith.constant 0 : index
    %c4_30 = arith.constant 4 : index
    %c0_31 = arith.constant 0 : index
    %c0_32 = arith.constant 0 : index
    %25 = vector.load %arg2[%c0_29, %c4_30, %c0_31, %c0_32] : memref<2x5x84x128xbf16, #tpu.memory_space<vmem>>, vector<1x1x84x128xbf16>
    %26 = vector.shape_cast %25 : vector<1x1x84x128xbf16> to vector<84x128xbf16>
    %cst_33 = arith.constant dense<0.000000e+00> : vector<8x128xf32>
    %27 = tpu.matmul %24, %26, %cst_33 {dimension_numbers = #tpu.dot_dimension_numbers<[1], [0], [0], [1], [0, 0, 1, 1], [], []>} : vector<8x84xbf16>, vector<84x128xbf16>, vector<8x128xf32> -> vector<8x128xf32>
    %28 = arith.addf %22, %27 : vector<8x128xf32>
    %c0_34 = arith.constant 0 : index
    %c0_35 = arith.constant 0 : index
    %c0_36 = arith.constant 0 : index
    %29 = vector.load %arg1[%c0_34, %c0_35, %c0_36] : memref<6x8x84xbf16, #tpu.memory_space<vmem>>, vector<1x8x84xbf16>
    %30 = vector.shape_cast %29 : vector<1x8x84xbf16> to vector<8x84xbf16>
    %c1_37 = arith.constant 1 : index
    %c0_38 = arith.constant 0 : index
    %c0_39 = arith.constant 0 : index
    %c0_40 = arith.constant 0 : index
    %31 = vector.load %arg2[%c1_37, %c0_38, %c0_39, %c0_40] : memref<2x5x84x128xbf16, #tpu.memory_space<vmem>>, vector<1x1x84x128xbf16>
    %32 = vector.shape_cast %31 : vector<1x1x84x128xbf16> to vector<84x128xbf16>
    %cst_41 = arith.constant dense<0.000000e+00> : vector<8x128xf32>
    %33 = tpu.matmul %30, %32, %cst_41 {dimension_numbers = #tpu.dot_dimension_numbers<[1], [0], [0], [1], [0, 0, 1, 1], [], []>} : vector<8x84xbf16>, vector<84x128xbf16>, vector<8x128xf32> -> vector<8x128xf32>
    %c1_42 = arith.constant 1 : index
    %c0_43 = arith.constant 0 : index
    %c0_44 = arith.constant 0 : index
    %34 = vector.load %arg1[%c1_42, %c0_43, %c0_44] : memref<6x8x84xbf16, #tpu.memory_space<vmem>>, vector<1x8x84xbf16>
    %35 = vector.shape_cast %34 : vector<1x8x84xbf16> to vector<8x84xbf16>
    %c1_45 = arith.constant 1 : index
    %c1_46 = arith.constant 1 : index
    %c0_47 = arith.constant 0 : index
    %c0_48 = arith.constant 0 : index
    %36 = vector.load %arg2[%c1_45, %c1_46, %c0_47, %c0_48] : memref<2x5x84x128xbf16, #tpu.memory_space<vmem>>, vector<1x1x84x128xbf16>
    %37 = vector.shape_cast %36 : vector<1x1x84x128xbf16> to vector<84x128xbf16>
    %cst_49 = arith.constant dense<0.000000e+00> : vector<8x128xf32>
    %38 = tpu.matmul %35, %37, %cst_49 {dimension_numbers = #tpu.dot_dimension_numbers<[1], [0], [0], [1], [0, 0, 1, 1], [], []>} : vector<8x84xbf16>, vector<84x128xbf16>, vector<8x128xf32> -> vector<8x128xf32>
    %39 = arith.addf %33, %38 : vector<8x128xf32>
    %c2_50 = arith.constant 2 : index
    %c0_51 = arith.constant 0 : index
    %c0_52 = arith.constant 0 : index
    %40 = vector.load %arg1[%c2_50, %c0_51, %c0_52] : memref<6x8x84xbf16, #tpu.memory_space<vmem>>, vector<1x8x84xbf16>
    %41 = vector.shape_cast %40 : vector<1x8x84xbf16> to vector<8x84xbf16>
    %c1_53 = arith.constant 1 : index
    %c2_54 = arith.constant 2 : index
    %c0_55 = arith.constant 0 : index
    %c0_56 = arith.constant 0 : index
    %42 = vector.load %arg2[%c1_53, %c2_54, %c0_55, %c0_56] : memref<2x5x84x128xbf16, #tpu.memory_space<vmem>>, vector<1x1x84x128xbf16>
    %43 = vector.shape_cast %42 : vector<1x1x84x128xbf16> to vector<84x128xbf16>
    %cst_57 = arith.constant dense<0.000000e+00> : vector<8x128xf32>
    %44 = tpu.matmul %41, %43, %cst_57 {dimension_numbers = #tpu.dot_dimension_numbers<[1], [0], [0], [1], [0, 0, 1, 1], [], []>} : vector<8x84xbf16>, vector<84x128xbf16>, vector<8x128xf32> -> vector<8x128xf32>
    %45 = arith.addf %39, %44 : vector<8x128xf32>
    %c3_58 = arith.constant 3 : index
    %c0_59 = arith.constant 0 : index
    %c0_60 = arith.constant 0 : index
    %46 = vector.load %arg1[%c3_58, %c0_59, %c0_60] : memref<6x8x84xbf16, #tpu.memory_space<vmem>>, vector<1x8x84xbf16>
    %47 = vector.shape_cast %46 : vector<1x8x84xbf16> to vector<8x84xbf16>
    %c1_61 = arith.constant 1 : index
    %c3_62 = arith.constant 3 : index
    %c0_63 = arith.constant 0 : index
    %c0_64 = arith.constant 0 : index
    %48 = vector.load %arg2[%c1_61, %c3_62, %c0_63, %c0_64] : memref<2x5x84x128xbf16, #tpu.memory_space<vmem>>, vector<1x1x84x128xbf16>
    %49 = vector.shape_cast %48 : vector<1x1x84x128xbf16> to vector<84x128xbf16>
    %cst_65 = arith.constant dense<0.000000e+00> : vector<8x128xf32>
    %50 = tpu.matmul %47, %49, %cst_65 {dimension_numbers = #tpu.dot_dimension_numbers<[1], [0], [0], [1], [0, 0, 1, 1], [], []>} : vector<8x84xbf16>, vector<84x128xbf16>, vector<8x128xf32> -> vector<8x128xf32>
    %51 = arith.addf %45, %50 : vector<8x128xf32>
    %c4_66 = arith.constant 4 : index
    %c0_67 = arith.constant 0 : index
    %c0_68 = arith.constant 0 : index
    %52 = vector.load %arg1[%c4_66, %c0_67, %c0_68] : memref<6x8x84xbf16, #tpu.memory_space<vmem>>, vector<1x8x84xbf16>
    %53 = vector.shape_cast %52 : vector<1x8x84xbf16> to vector<8x84xbf16>
    %c1_69 = arith.constant 1 : index
    %c4_70 = arith.constant 4 : index
    %c0_71 = arith.constant 0 : index
    %c0_72 = arith.constant 0 : index
    %54 = vector.load %arg2[%c1_69, %c4_70, %c0_71, %c0_72] : memref<2x5x84x128xbf16, #tpu.memory_space<vmem>>, vector<1x1x84x128xbf16>
    %55 = vector.shape_cast %54 : vector<1x1x84x128xbf16> to vector<84x128xbf16>
    %cst_73 = arith.constant dense<0.000000e+00> : vector<8x128xf32>
    %56 = tpu.matmul %53, %55, %cst_73 {dimension_numbers = #tpu.dot_dimension_numbers<[1], [0], [0], [1], [0, 0, 1, 1], [], []>} : vector<8x84xbf16>, vector<84x128xbf16>, vector<8x128xf32> -> vector<8x128xf32>
    %57 = arith.addf %51, %56 : vector<8x128xf32>
    %58 = arith.maximumf %28, %57 : vector<8x128xf32>
    %c1_74 = arith.constant 1 : index
    %c0_75 = arith.constant 0 : index
    %c0_76 = arith.constant 0 : index
    %59 = vector.load %arg1[%c1_74, %c0_75, %c0_76] : memref<6x8x84xbf16, #tpu.memory_space<vmem>>, vector<1x8x84xbf16>
    %60 = vector.shape_cast %59 : vector<1x8x84xbf16> to vector<8x84xbf16>
    %c0_77 = arith.constant 0 : index
    %c0_78 = arith.constant 0 : index
    %c0_79 = arith.constant 0 : index
    %c0_80 = arith.constant 0 : index
    %61 = vector.load %arg2[%c0_77, %c0_78, %c0_79, %c0_80] : memref<2x5x84x128xbf16, #tpu.memory_space<vmem>>, vector<1x1x84x128xbf16>
    %62 = vector.shape_cast %61 : vector<1x1x84x128xbf16> to vector<84x128xbf16>
    %cst_81 = arith.constant dense<0.000000e+00> : vector<8x128xf32>
    %63 = tpu.matmul %60, %62, %cst_81 {dimension_numbers = #tpu.dot_dimension_numbers<[1], [0], [0], [1], [0, 0, 1, 1], [], []>} : vector<8x84xbf16>, vector<84x128xbf16>, vector<8x128xf32> -> vector<8x128xf32>
    %c2_82 = arith.constant 2 : index
    %c0_83 = arith.constant 0 : index
    %c0_84 = arith.constant 0 : index
    %64 = vector.load %arg1[%c2_82, %c0_83, %c0_84] : memref<6x8x84xbf16, #tpu.memory_space<vmem>>, vector<1x8x84xbf16>
    %65 = vector.shape_cast %64 : vector<1x8x84xbf16> to vector<8x84xbf16>
    %c0_85 = arith.constant 0 : index
    %c1_86 = arith.constant 1 : index
    %c0_87 = arith.constant 0 : index
    %c0_88 = arith.constant 0 : index
    %66 = vector.load %arg2[%c0_85, %c1_86, %c0_87, %c0_88] : memref<2x5x84x128xbf16, #tpu.memory_space<vmem>>, vector<1x1x84x128xbf16>
    %67 = vector.shape_cast %66 : vector<1x1x84x128xbf16> to vector<84x128xbf16>
    %cst_89 = arith.constant dense<0.000000e+00> : vector<8x128xf32>
    %68 = tpu.matmul %65, %67, %cst_89 {dimension_numbers = #tpu.dot_dimension_numbers<[1], [0], [0], [1], [0, 0, 1, 1], [], []>} : vector<8x84xbf16>, vector<84x128xbf16>, vector<8x128xf32> -> vector<8x128xf32>
    %69 = arith.addf %63, %68 : vector<8x128xf32>
    %c3_90 = arith.constant 3 : index
    %c0_91 = arith.constant 0 : index
    %c0_92 = arith.constant 0 : index
    %70 = vector.load %arg1[%c3_90, %c0_91, %c0_92] : memref<6x8x84xbf16, #tpu.memory_space<vmem>>, vector<1x8x84xbf16>
    %71 = vector.shape_cast %70 : vector<1x8x84xbf16> to vector<8x84xbf16>
    %c0_93 = arith.constant 0 : index
    %c2_94 = arith.constant 2 : index
    %c0_95 = arith.constant 0 : index
    %c0_96 = arith.constant 0 : index
    %72 = vector.load %arg2[%c0_93, %c2_94, %c0_95, %c0_96] : memref<2x5x84x128xbf16, #tpu.memory_space<vmem>>, vector<1x1x84x128xbf16>
    %73 = vector.shape_cast %72 : vector<1x1x84x128xbf16> to vector<84x128xbf16>
    %cst_97 = arith.constant dense<0.000000e+00> : vector<8x128xf32>
    %74 = tpu.matmul %71, %73, %cst_97 {dimension_numbers = #tpu.dot_dimension_numbers<[1], [0], [0], [1], [0, 0, 1, 1], [], []>} : vector<8x84xbf16>, vector<84x128xbf16>, vector<8x128xf32> -> vector<8x128xf32>
    %75 = arith.addf %69, %74 : vector<8x128xf32>
    %c4_98 = arith.constant 4 : index
    %c0_99 = arith.constant 0 : index
    %c0_100 = arith.constant 0 : index
    %76 = vector.load %arg1[%c4_98, %c0_99, %c0_100] : memref<6x8x84xbf16, #tpu.memory_space<vmem>>, vector<1x8x84xbf16>
    %77 = vector.shape_cast %76 : vector<1x8x84xbf16> to vector<8x84xbf16>
    %c0_101 = arith.constant 0 : index
    %c3_102 = arith.constant 3 : index
    %c0_103 = arith.constant 0 : index
    %c0_104 = arith.constant 0 : index
    %78 = vector.load %arg2[%c0_101, %c3_102, %c0_103, %c0_104] : memref<2x5x84x128xbf16, #tpu.memory_space<vmem>>, vector<1x1x84x128xbf16>
    %79 = vector.shape_cast %78 : vector<1x1x84x128xbf16> to vector<84x128xbf16>
    %cst_105 = arith.constant dense<0.000000e+00> : vector<8x128xf32>
    %80 = tpu.matmul %77, %79, %cst_105 {dimension_numbers = #tpu.dot_dimension_numbers<[1], [0], [0], [1], [0, 0, 1, 1], [], []>} : vector<8x84xbf16>, vector<84x128xbf16>, vector<8x128xf32> -> vector<8x128xf32>
    %81 = arith.addf %75, %80 : vector<8x128xf32>
    %c5 = arith.constant 5 : index
    %c0_106 = arith.constant 0 : index
    %c0_107 = arith.constant 0 : index
    %82 = vector.load %arg1[%c5, %c0_106, %c0_107] : memref<6x8x84xbf16, #tpu.memory_space<vmem>>, vector<1x8x84xbf16>
    %83 = vector.shape_cast %82 : vector<1x8x84xbf16> to vector<8x84xbf16>
    %c0_108 = arith.constant 0 : index
    %c4_109 = arith.constant 4 : index
    %c0_110 = arith.constant 0 : index
    %c0_111 = arith.constant 0 : index
    %84 = vector.load %arg2[%c0_108, %c4_109, %c0_110, %c0_111] : memref<2x5x84x128xbf16, #tpu.memory_space<vmem>>, vector<1x1x84x128xbf16>
    %85 = vector.shape_cast %84 : vector<1x1x84x128xbf16> to vector<84x128xbf16>
    %cst_112 = arith.constant dense<0.000000e+00> : vector<8x128xf32>
    %86 = tpu.matmul %83, %85, %cst_112 {dimension_numbers = #tpu.dot_dimension_numbers<[1], [0], [0], [1], [0, 0, 1, 1], [], []>} : vector<8x84xbf16>, vector<84x128xbf16>, vector<8x128xf32> -> vector<8x128xf32>
    %87 = arith.addf %81, %86 : vector<8x128xf32>
    %88 = arith.maximumf %58, %87 : vector<8x128xf32>
    %c1_113 = arith.constant 1 : index
    %c0_114 = arith.constant 0 : index
    %c0_115 = arith.constant 0 : index
    %89 = vector.load %arg1[%c1_113, %c0_114, %c0_115] : memref<6x8x84xbf16, #tpu.memory_space<vmem>>, vector<1x8x84xbf16>
    %90 = vector.shape_cast %89 : vector<1x8x84xbf16> to vector<8x84xbf16>
    %c1_116 = arith.constant 1 : index
    %c0_117 = arith.constant 0 : index
    %c0_118 = arith.constant 0 : index
    %c0_119 = arith.constant 0 : index
    %91 = vector.load %arg2[%c1_116, %c0_117, %c0_118, %c0_119] : memref<2x5x84x128xbf16, #tpu.memory_space<vmem>>, vector<1x1x84x128xbf16>
    %92 = vector.shape_cast %91 : vector<1x1x84x128xbf16> to vector<84x128xbf16>
    %cst_120 = arith.constant dense<0.000000e+00> : vector<8x128xf32>
    %93 = tpu.matmul %90, %92, %cst_120 {dimension_numbers = #tpu.dot_dimension_numbers<[1], [0], [0], [1], [0, 0, 1, 1], [], []>} : vector<8x84xbf16>, vector<84x128xbf16>, vector<8x128xf32> -> vector<8x128xf32>
    %c2_121 = arith.constant 2 : index
    %c0_122 = arith.constant 0 : index
    %c0_123 = arith.constant 0 : index
    %94 = vector.load %arg1[%c2_121, %c0_122, %c0_123] : memref<6x8x84xbf16, #tpu.memory_space<vmem>>, vector<1x8x84xbf16>
    %95 = vector.shape_cast %94 : vector<1x8x84xbf16> to vector<8x84xbf16>
    %c1_124 = arith.constant 1 : index
    %c1_125 = arith.constant 1 : index
    %c0_126 = arith.constant 0 : index
    %c0_127 = arith.constant 0 : index
    %96 = vector.load %arg2[%c1_124, %c1_125, %c0_126, %c0_127] : memref<2x5x84x128xbf16, #tpu.memory_space<vmem>>, vector<1x1x84x128xbf16>
    %97 = vector.shape_cast %96 : vector<1x1x84x128xbf16> to vector<84x128xbf16>
    %cst_128 = arith.constant dense<0.000000e+00> : vector<8x128xf32>
    %98 = tpu.matmul %95, %97, %cst_128 {dimension_numbers = #tpu.dot_dimension_numbers<[1], [0], [0], [1], [0, 0, 1, 1], [], []>} : vector<8x84xbf16>, vector<84x128xbf16>, vector<8x128xf32> -> vector<8x128xf32>
    %99 = arith.addf %93, %98 : vector<8x128xf32>
    %c3_129 = arith.constant 3 : index
    %c0_130 = arith.constant 0 : index
    %c0_131 = arith.constant 0 : index
    %100 = vector.load %arg1[%c3_129, %c0_130, %c0_131] : memref<6x8x84xbf16, #tpu.memory_space<vmem>>, vector<1x8x84xbf16>
    %101 = vector.shape_cast %100 : vector<1x8x84xbf16> to vector<8x84xbf16>
    %c1_132 = arith.constant 1 : index
    %c2_133 = arith.constant 2 : index
    %c0_134 = arith.constant 0 : index
    %c0_135 = arith.constant 0 : index
    %102 = vector.load %arg2[%c1_132, %c2_133, %c0_134, %c0_135] : memref<2x5x84x128xbf16, #tpu.memory_space<vmem>>, vector<1x1x84x128xbf16>
    %103 = vector.shape_cast %102 : vector<1x1x84x128xbf16> to vector<84x128xbf16>
    %cst_136 = arith.constant dense<0.000000e+00> : vector<8x128xf32>
    %104 = tpu.matmul %101, %103, %cst_136 {dimension_numbers = #tpu.dot_dimension_numbers<[1], [0], [0], [1], [0, 0, 1, 1], [], []>} : vector<8x84xbf16>, vector<84x128xbf16>, vector<8x128xf32> -> vector<8x128xf32>
    %105 = arith.addf %99, %104 : vector<8x128xf32>
    %c4_137 = arith.constant 4 : index
    %c0_138 = arith.constant 0 : index
    %c0_139 = arith.constant 0 : index
    %106 = vector.load %arg1[%c4_137, %c0_138, %c0_139] : memref<6x8x84xbf16, #tpu.memory_space<vmem>>, vector<1x8x84xbf16>
    %107 = vector.shape_cast %106 : vector<1x8x84xbf16> to vector<8x84xbf16>
    %c1_140 = arith.constant 1 : index
    %c3_141 = arith.constant 3 : index
    %c0_142 = arith.constant 0 : index
    %c0_143 = arith.constant 0 : index
    %108 = vector.load %arg2[%c1_140, %c3_141, %c0_142, %c0_143] : memref<2x5x84x128xbf16, #tpu.memory_space<vmem>>, vector<1x1x84x128xbf16>
    %109 = vector.shape_cast %108 : vector<1x1x84x128xbf16> to vector<84x128xbf16>
    %cst_144 = arith.constant dense<0.000000e+00> : vector<8x128xf32>
    %110 = tpu.matmul %107, %109, %cst_144 {dimension_numbers = #tpu.dot_dimension_numbers<[1], [0], [0], [1], [0, 0, 1, 1], [], []>} : vector<8x84xbf16>, vector<84x128xbf16>, vector<8x128xf32> -> vector<8x128xf32>
    %111 = arith.addf %105, %110 : vector<8x128xf32>
    %c5_145 = arith.constant 5 : index
    %c0_146 = arith.constant 0 : index
    %c0_147 = arith.constant 0 : index
    %112 = vector.load %arg1[%c5_145, %c0_146, %c0_147] : memref<6x8x84xbf16, #tpu.memory_space<vmem>>, vector<1x8x84xbf16>
    %113 = vector.shape_cast %112 : vector<1x8x84xbf16> to vector<8x84xbf16>
    %c1_148 = arith.constant 1 : index
    %c4_149 = arith.constant 4 : index
    %c0_150 = arith.constant 0 : index
    %c0_151 = arith.constant 0 : index
    %114 = vector.load %arg2[%c1_148, %c4_149, %c0_150, %c0_151] : memref<2x5x84x128xbf16, #tpu.memory_space<vmem>>, vector<1x1x84x128xbf16>
    %115 = vector.shape_cast %114 : vector<1x1x84x128xbf16> to vector<84x128xbf16>
    %cst_152 = arith.constant dense<0.000000e+00> : vector<8x128xf32>
    %116 = tpu.matmul %113, %115, %cst_152 {dimension_numbers = #tpu.dot_dimension_numbers<[1], [0], [0], [1], [0, 0, 1, 1], [], []>} : vector<8x84xbf16>, vector<84x128xbf16>, vector<8x128xf32> -> vector<8x128xf32>
    %117 = arith.addf %111, %116 : vector<8x128xf32>
    %118 = arith.maximumf %88, %117 : vector<8x128xf32>
    %c0_153 = arith.constant 0 : index
    %c0_154 = arith.constant 0 : index
    %119 = vector.load %arg3[%c0_153, %c0_154] : memref<1x128xf32, #tpu.memory_space<vmem>>, vector<1x128xf32>
    %120 = vector.broadcast %119 : vector<1x128xf32> to vector<8x128xf32>
    %121 = arith.addf %118, %120 : vector<8x128xf32>
    %cst_155 = arith.constant 0.000000e+00 : f32
    %122 = vector.broadcast %cst_155 : f32 to vector<8x128xf32>
    %123 = arith.maximumf %121, %122 : vector<8x128xf32>
    %124 = arith.truncf %123 : vector<8x128xf32> to vector<8x128xbf16>
    %c0_156 = arith.constant 0 : index
    %c0_157 = arith.constant 0 : index
    %125 = vector.load %arg4[%c0_156, %c0_157] : memref<8x128xbf16, #tpu.memory_space<vmem>>, vector<8x128xbf16>
    tpu.vector_store %arg4[%c0_156, %c0_157], %124 {strides = array<i32>} : memref<8x128xbf16, #tpu.memory_space<vmem>>, vector<8x128xbf16>,
    return
  }
  func.func @transform_0(%arg0: i32) -> (i32, i32, i32) {
    %c0_i32 = arith.constant 0 : i32
    %c0_i32_0 = arith.constant 0 : i32
    %c0_i32_1 = arith.constant 0 : i32
    return %c0_i32, %arg0, %c0_i32_0 : i32, i32, i32
  }
  func.func @transform_1(%arg0: i32) -> (i32, i32, i32, i32) {
    %c0_i32 = arith.constant 0 : i32
    %c0_i32_0 = arith.constant 0 : i32
    %c0_i32_1 = arith.constant 0 : i32
    %c0_i32_2 = arith.constant 0 : i32
    %c0_i32_3 = arith.constant 0 : i32
    return %c0_i32, %c0_i32_0, %c0_i32_1, %c0_i32_2 : i32, i32, i32, i32
  }
  func.func @transform_2(%arg0: i32) -> (i32, i32) {
    %c0_i32 = arith.constant 0 : i32
    %c0_i32_0 = arith.constant 0 : i32
    %c0_i32_1 = arith.constant 0 : i32
    return %c0_i32, %c0_i32_0 : i32, i32
  }
  func.func @transform_3(%arg0: i32) -> (i32, i32) {
    %c0_i32 = arith.constant 0 : i32
    %c0_i32_0 = arith.constant 0 : i32
    return %arg0, %c0_i32 : i32, i32
  }
}

module attributes {stable_mosaic.version = 11 : i64} {
  func.func @_fc_head_kernel(%arg0: i32, %arg1: memref<8x400xbf16, #tpu.memory_space<vmem>>, %arg2: memref<400x128xbf16, #tpu.memory_space<vmem>>, %arg3: memref<1x128xf32, #tpu.memory_space<vmem>>, %arg4: memref<128x128xbf16, #tpu.memory_space<vmem>>, %arg5: memref<1x128xf32, #tpu.memory_space<vmem>>, %arg6: memref<128x128xbf16, #tpu.memory_space<vmem>>, %arg7: memref<1x128xf32, #tpu.memory_space<vmem>>, %arg8: memref<8x128xf32, #tpu.memory_space<vmem>>) attributes {dimension_semantics = [#tpu.dimension_semantics<parallel>], iteration_bounds = array<i64: 1>, scalar_prefetch = 0 : i64, scratch_operands = 0 : i64, tpu.core_type = #tpu.core_type<tc>, window_params = [{transform_indices = @transform_0, window_bounds = array<i64: 8, 400>}, {pipeline_mode = #tpu.pipeline_mode<synchronous>, transform_indices = @transform_1, window_bounds = array<i64: 400, 128>}, {pipeline_mode = #tpu.pipeline_mode<synchronous>, transform_indices = @transform_2, window_bounds = array<i64: 1, 128>}, {pipeline_mode = #tpu.pipeline_mode<synchronous>, transform_indices = @transform_3, window_bounds = array<i64: 128, 128>}, {pipeline_mode = #tpu.pipeline_mode<synchronous>, transform_indices = @transform_4, window_bounds = array<i64: 1, 128>}, {pipeline_mode = #tpu.pipeline_mode<synchronous>, transform_indices = @transform_5, window_bounds = array<i64: 128, 128>}, {pipeline_mode = #tpu.pipeline_mode<synchronous>, transform_indices = @transform_6, window_bounds = array<i64: 1, 128>}, {transform_indices = @transform_7, window_bounds = array<i64: 8, 128>}]} {
    %c0 = arith.constant 0 : index
    %c0_0 = arith.constant 0 : index
    %0 = vector.load %arg1[%c0, %c0_0] : memref<8x400xbf16, #tpu.memory_space<vmem>>, vector<8x400xbf16>
    %c0_1 = arith.constant 0 : index
    %c0_2 = arith.constant 0 : index
    %1 = vector.load %arg2[%c0_1, %c0_2] : memref<400x128xbf16, #tpu.memory_space<vmem>>, vector<400x128xbf16>
    %cst = arith.constant dense<0.000000e+00> : vector<8x128xf32>
    %2 = tpu.matmul %0, %1, %cst {dimension_numbers = #tpu.dot_dimension_numbers<[1], [0], [0], [1], [0, 0, 1, 1], [], []>} : vector<8x400xbf16>, vector<400x128xbf16>, vector<8x128xf32> -> vector<8x128xf32>
    %c0_3 = arith.constant 0 : index
    %c0_4 = arith.constant 0 : index
    %3 = vector.load %arg3[%c0_3, %c0_4] : memref<1x128xf32, #tpu.memory_space<vmem>>, vector<1x128xf32>
    %4 = vector.broadcast %3 : vector<1x128xf32> to vector<8x128xf32>
    %5 = arith.addf %2, %4 : vector<8x128xf32>
    %cst_5 = arith.constant 0.000000e+00 : f32
    %6 = vector.broadcast %cst_5 : f32 to vector<8x128xf32>
    %7 = arith.maximumf %5, %6 : vector<8x128xf32>
    %8 = arith.truncf %7 : vector<8x128xf32> to vector<8x128xbf16>
    %c0_6 = arith.constant 0 : index
    %c0_7 = arith.constant 0 : index
    %9 = vector.load %arg4[%c0_6, %c0_7] : memref<128x128xbf16, #tpu.memory_space<vmem>>, vector<128x128xbf16>
    %cst_8 = arith.constant dense<0.000000e+00> : vector<8x128xf32>
    %10 = tpu.matmul %8, %9, %cst_8 {dimension_numbers = #tpu.dot_dimension_numbers<[1], [0], [0], [1], [0, 0, 1, 1], [], []>} : vector<8x128xbf16>, vector<128x128xbf16>, vector<8x128xf32> -> vector<8x128xf32>
    %c0_9 = arith.constant 0 : index
    %c0_10 = arith.constant 0 : index
    %11 = vector.load %arg5[%c0_9, %c0_10] : memref<1x128xf32, #tpu.memory_space<vmem>>, vector<1x128xf32>
    %12 = vector.broadcast %11 : vector<1x128xf32> to vector<8x128xf32>
    %13 = arith.addf %10, %12 : vector<8x128xf32>
    %cst_11 = arith.constant 0.000000e+00 : f32
    %14 = vector.broadcast %cst_11 : f32 to vector<8x128xf32>
    %15 = arith.maximumf %13, %14 : vector<8x128xf32>
    %16 = arith.truncf %15 : vector<8x128xf32> to vector<8x128xbf16>
    %c0_12 = arith.constant 0 : index
    %c0_13 = arith.constant 0 : index
    %17 = vector.load %arg6[%c0_12, %c0_13] : memref<128x128xbf16, #tpu.memory_space<vmem>>, vector<128x128xbf16>
    %cst_14 = arith.constant dense<0.000000e+00> : vector<8x128xf32>
    %18 = tpu.matmul %16, %17, %cst_14 {dimension_numbers = #tpu.dot_dimension_numbers<[1], [0], [0], [1], [0, 0, 1, 1], [], []>} : vector<8x128xbf16>, vector<128x128xbf16>, vector<8x128xf32> -> vector<8x128xf32>
    %c0_15 = arith.constant 0 : index
    %c0_16 = arith.constant 0 : index
    %19 = vector.load %arg7[%c0_15, %c0_16] : memref<1x128xf32, #tpu.memory_space<vmem>>, vector<1x128xf32>
    %20 = vector.broadcast %19 : vector<1x128xf32> to vector<8x128xf32>
    %21 = arith.addf %18, %20 : vector<8x128xf32>
    %c0_17 = arith.constant 0 : index
    %c0_18 = arith.constant 0 : index
    %22 = vector.load %arg8[%c0_17, %c0_18] : memref<8x128xf32, #tpu.memory_space<vmem>>, vector<8x128xf32>
    tpu.vector_store %arg8[%c0_17, %c0_18], %21 {strides = array<i32>} : memref<8x128xf32, #tpu.memory_space<vmem>>, vector<8x128xf32>,
    return
  }
  func.func @transform_0(%arg0: i32) -> (i32, i32) {
    %c0_i32 = arith.constant 0 : i32
    %c0_i32_0 = arith.constant 0 : i32
    return %arg0, %c0_i32 : i32, i32
  }
  func.func @transform_1(%arg0: i32) -> (i32, i32) {
    %c0_i32 = arith.constant 0 : i32
    %c0_i32_0 = arith.constant 0 : i32
    %c0_i32_1 = arith.constant 0 : i32
    return %c0_i32, %c0_i32_0 : i32, i32
  }
  func.func @transform_2(%arg0: i32) -> (i32, i32) {
    %c0_i32 = arith.constant 0 : i32
    %c0_i32_0 = arith.constant 0 : i32
    %c0_i32_1 = arith.constant 0 : i32
    return %c0_i32, %c0_i32_0 : i32, i32
  }
  func.func @transform_3(%arg0: i32) -> (i32, i32) {
    %c0_i32 = arith.constant 0 : i32
    %c0_i32_0 = arith.constant 0 : i32
    %c0_i32_1 = arith.constant 0 : i32
    return %c0_i32, %c0_i32_0 : i32, i32
  }
  func.func @transform_4(%arg0: i32) -> (i32, i32) {
    %c0_i32 = arith.constant 0 : i32
    %c0_i32_0 = arith.constant 0 : i32
    %c0_i32_1 = arith.constant 0 : i32
    return %c0_i32, %c0_i32_0 : i32, i32
  }
  func.func @transform_5(%arg0: i32) -> (i32, i32) {
    %c0_i32 = arith.constant 0 : i32
    %c0_i32_0 = arith.constant 0 : i32
    %c0_i32_1 = arith.constant 0 : i32
    return %c0_i32, %c0_i32_0 : i32, i32
  }
  func.func @transform_6(%arg0: i32) -> (i32, i32) {
    %c0_i32 = arith.constant 0 : i32
    %c0_i32_0 = arith.constant 0 : i32
    %c0_i32_1 = arith.constant 0 : i32
    return %c0_i32, %c0_i32_0 : i32, i32
  }
  func.func @transform_7(%arg0: i32) -> (i32, i32) {
    %c0_i32 = arith.constant 0 : i32
    %c0_i32_0 = arith.constant 0 : i32
    return %arg0, %c0_i32 : i32, i32
  }
}

</mosaic_0001>

<bundles_post_ra>
// kernel: net_forward.3
= control target key start
LH: loop header
LB: loop body
LE: loop exit
PB: predicated region body
PF: predicated region fallthrough
CT: control target
= control target key end

     0   :  { %s2638_s12 = smov 0   ;;  %s2640_s13 = smov 0   ;;  %s3325_s0 = inlined_call_operand.vmem [shape: bf16[6,32,96], index: 0, kind: input, shape index: {}]   ;;  %s3326_s1 = inlined_call_operand.vmem [shape: bf16[2,5,96,128], index: 1, kind: input, shape index: {}]   ;;  %s3327_s2 = inlined_call_operand.vmem [shape: f32[1,128], index: 2, kind: input, shape index: {}]   ;;  %s3328_s3 = inlined_call_operand.vmem [shape: bf16[32,128], index: 3, kind: output, shape index: {}]  }
   0x1   :  { %s2642_s14 = smov 0  }
   0x2 LB: > { %s1748_s15 = sadd.s32 4294967295, %s2614_s14   ;;  %s2655_s16 = sadd.s32 1, %s2614_s14   ;;  %s2614_s14 = sphi %s2642_s14, %s3334_s14   ;;  %s2610_s13 = sphi %s2640_s13, %s3333_s13   ;;  %s2606_s12 = sphi %s2638_s12, %s3332_s12  }
   0x3   : > { %s17_s17 = ssub.s32 %s2614_s14, %s2655_s16  ;;  %s20_s18 = sadd.s32 1, %s2610_s13 }
   0x4   : > { %p18_p0 = scmp.eq.s32.totalorder %s17_s17, 0  ;;  %p27_p1 = scmp.ne.s32.totalorder %s2610_s13, %s2606_s12 }
   0x5   : > { %p28_p2 = scmp.eq.s32.totalorder %s2614_s14, 0  ;;  %p1751_p4 = scmp.ge.s32.totalorder %s2614_s14, 2 }
   0x6   : > { %s2664_s19 = scalar_select %p18_p0, %s2610_s13, %s20_s18  }
   0x7   : > { %p29_p3 = por %p28_p2, %p27_p1  ;;  %127 = sbr.rel (%p1751_p4) target bundleno = 21 (0x15), region = 24 }
   0xe   : > { %130 = sbr.rel (!%p29_p3) target bundleno = 21 (0x15), region = 28  ;;  %s132_s20 = sand.u32 (%p29_p3), 1, %s2610_s13  }
   0xf   : > { %s1966_s21 = sshll.u32 (%p29_p3), %s2614_s14, 3  ;;  %s2498_s22 = smul.u32 (%p29_p3), 48, %s132_s20 }
  0x10   : > { %s137_s25 = scalar_lea.vmem (%p29_p3), %s3325_s0, %s1966_s21 }
  0x11   : > { %v153_v0 = vld [vmem:[%s137_s25] sm:$0xff] (%p29_p3)   ;;  %v157_v1 = vld [vmem:[%s137_s25 + $0x10] sm:$0xff] (%p29_p3)   ;;  %s134_s26 = scalar_lea.vmem (%p29_p3), [#allocation2], %s2498_s22 }
  0x12   : > { %v161_v2 = vld [vmem:[%s137_s25 + $0x20] sm:$0xff] (%p29_p3)   ;;  %v165_v3 = vld [vmem:[%s137_s25 + $0x30] sm:$0xff] (%p29_p3)   ;;  %154 = vst [vmem:[%s134_s26] sm:$0xff] (%p29_p3), %v153_v0   ;;  %158 = vst [vmem:[%s134_s26 + $0x8] sm:$0xff] (%p29_p3), %v157_v1  }
  0x13   : > { %v169_v4 = vld [vmem:[%s137_s25 + $0x40] sm:$0xff] (%p29_p3)   ;;  %v173_v5 = vld [vmem:[%s137_s25 + $0x50] sm:$0xff] (%p29_p3)   ;;  %162 = vst [vmem:[%s134_s26 + $0x10] sm:$0xff] (%p29_p3), %v161_v2   ;;  %166 = vst [vmem:[%s134_s26 + $0x18] sm:$0xff] (%p29_p3), %v165_v3  }
  0x14   : > { %170 = vst [vmem:[%s134_s26 + $0x20] sm:$0xff] (%p29_p3), %v169_v4   ;;  %174 = vst [vmem:[%s134_s26 + $0x28] sm:$0xff] (%p29_p3), %v173_v5  }
  0x15 PF: > { %p1754_p5 = scmp.ge.s32.totalorder %s2614_s14, 1  ;;  %p222_p6 = scmp.lt.s32.totalorder %s2614_s14, 3 }
  0x17   : > { %p223_p7 = pnand %p1754_p5, %p222_p6 }
  0x19   : > { %226 = sbr.rel (%p223_p7) target bundleno = 498 (0x1f2), region = 69 }
  0x20   : > { %v2677_v6 = vld [vmem:[%s3326_s1 + $0x30] sm:$0xff]   ;;  %v2616_v7 = vmov 0.0   ;;  %v2684_v8 = vld [vmem:[%s3326_s1 + $0x120] sm:$0xff]   ;;  %v2690_v9 = vld [vmem:[%s3326_s1 + $0x38] sm:$0xff]   ;;  %vm2617_vm0 = vmmov 0   ;;  %s229_s8 = sand.u32 1, %s2606_s12  }
  0x21   : > { %2114 = vmatprep.subr.bf16.mxu0 %v2616_v7  ;;  %2194 = vmatprep.subr.bf16.mxu1 %v2616_v7  ;;  %v2699_v10 = vld [vmem:[%s3326_s1 + $0x128] sm:$0xff]   ;;  %v2709_v11 = vld [vmem:[%s3326_s1 + $0x40] sm:$0xff]   ;;  %v2716_v12 = vld [vmem:[%s3326_s1 + $0x130] sm:$0xff]   ;;  %s2499_s18 = smul.u32 48, %s229_s8  ;;  %vm331_vm1 = vcmask 785408  }
  0x22   : > { %2115 = vmatpush3.bf16.msra.mxu0 %v2677_v6  ;;  %2126 = vmatprep.mubr.msk.bf16.mxu0 %vm2617_vm0, %v2616_v7  ;;  %v2723_v13 = vld [vmem:[%s3326_s1 + $0x48] sm:$0xff]   ;;  %v2730_v14 = vld [vmem:[%s3326_s1 + $0x138] sm:$0xff]   ;;  %v2739_v15 = vld [vmem:[%s3326_s1 + $0x50] sm:$0xff]  }
  0x23   : > { %2195 = vmatpush3.bf16.msra.mxu1 %v2684_v8  ;;  %2116 = vmatprep.subr.bf16.mxu0 %v2616_v7  ;;  %s2733_s23 = scalar_lea.vmem [#allocation2], %s2499_s18  ;;  %v2746_v16 = vld [vmem:[%s3326_s1 + $0x140] sm:$0xff]   ;;  %v2753_v17 = vld [vmem:[%s3326_s1 + $0x58] sm:$0xff]   ;;  %v2760_v18 = vld [vmem:[%s3326_s1 + $0x148] sm:$0xff]  }
  0x24   : > { %2196 = vmatprep.subr.bf16.mxu1 %v2616_v7  ;;  %2206 = vmatprep.mubr.msk.bf16.mxu1 %vm2617_vm0, %v2616_v7  ;;  %v2764_v19 = vld [vmem:[%s2733_s23 + $0x8] sm:$0xff]   ;;  %v2770_v20 = vld [vmem:[%s3326_s1] sm:$0xff]   ;;  %v2777_v21 = vld [vmem:[%s3326_s1 + $0xf0] sm:$0xff]  }
  0x25   : > { %v2788_v22 = vld [vmem:[%s3326_s1 + $0x8] sm:$0xff]   ;;  %v2795_v23 = vld [vmem:[%s3326_s1 + $0xf8] sm:$0xff]   ;;  %v2806_v24 = vld [vmem:[%s3326_s1 + $0x10] sm:$0xff]  }
  0x26   : > { %2117 = vmatpush3.bf16.msra.mxu0 %v2690_v9  ;;  %v2813_v25 = vld [vmem:[%s3326_s1 + $0x100] sm:$0xff]   ;;  %v2820_v26 = vld [vmem:[%s3326_s1 + $0x18] sm:$0xff]   ;;  %v2827_v27 = vld [vmem:[%s3326_s1 + $0x108] sm:$0xff]  }
  0x27   : > { %2197 = vmatpush3.bf16.msra.mxu1 %v2699_v10  ;;  %2118 = vmatprep.subr.bf16.mxu0 %v2616_v7  ;;  %v2834_v28 = vld [vmem:[%s3326_s1 + $0x20] sm:$0xff]   ;;  %v2841_v29 = vld [vmem:[%s3326_s1 + $0x110] sm:$0xff]   ;;  %v2848_v30 = vld [vmem:[%s3326_s1 + $0x28] sm:$0xff]  }
  0x28   : > { %2198 = vmatprep.subr.bf16.mxu1 %v2616_v7  ;;  %v2855_v31 = vld [vmem:[%s3326_s1 + $0x118] sm:$0xff]   ;;  %v2551_v32 = vld [vmem:[%s2733_s23] sm:$0xff]   ;;  %v2879_v35 = vld [vmem:[%s3326_s1 + $0x68] sm:$0xff]  }
  0x29   : > { %v2863_v33 = vld [vmem:[%s3326_s1 + $0x60] sm:$0xff]   ;;  %v2870_v34 = vld [vmem:[%s3326_s1 + $0x150] sm:$0xff]   ;;  %v2886_v36 = vld [vmem:[%s3326_s1 + $0x158] sm:$0xff]  }
  0x2a   : > { %2119 = vmatpush3.bf16.msra.mxu0 %v2709_v11  ;;  %v2897_v37 = vld [vmem:[%s3326_s1 + $0x70] sm:$0xff]   ;;  %v2904_v38 = vld [vmem:[%s3326_s1 + $0x160] sm:$0xff]   ;;  %v2911_v39 = vld [vmem:[%s3326_s1 + $0x78] sm:$0xff]  }
  0x2b   : > { %2199 = vmatpush3.bf16.msra.mxu1 %v2716_v12  ;;  %2120 = vmatprep.subr.bf16.mxu0 %v2616_v7  ;;  %v2918_v40 = vld [vmem:[%s3326_s1 + $0x168] sm:$0xff]   ;;  %v2925_v41 = vld [vmem:[%s3326_s1 + $0x80] sm:$0xff]   ;;  %v2932_v42 = vld [vmem:[%s3326_s1 + $0x170] sm:$0xff]  }
  0x2c   : > { %2200 = vmatprep.subr.bf16.mxu1 %v2616_v7  ;;  %v2939_v43 = vld [vmem:[%s3326_s1 + $0x88] sm:$0xff]   ;;  %v2946_v44 = vld [vmem:[%s3326_s1 + $0x178] sm:$0xff]   ;;  %v2950_v45 = vld [vmem:[%s2733_s23 + $0x10] sm:$0xff]  }
  0x2d   : > { %v2956_v46 = vld [vmem:[%s3326_s1 + $0x90] sm:$0xff]   ;;  %v2963_v47 = vld [vmem:[%s3326_s1 + $0x180] sm:$0xff]   ;;  %v2974_v48 = vld [vmem:[%s3326_s1 + $0x98] sm:$0xff]  }
  0x2e   : > { %2121 = vmatpush3.bf16.msra.mxu0 %v2723_v13  ;;  %v2981_v49 = vld [vmem:[%s3326_s1 + $0x188] sm:$0xff]   ;;  %v2992_v50 = vld [vmem:[%s3326_s1 + $0xa0] sm:$0xff]   ;;  %v2999_v51 = vld [vmem:[%s3326_s1 + $0x190] sm:$0xff]  }
  0x2f   : > { %2201 = vmatpush3.bf16.msra.mxu1 %v2730_v14  ;;  %2122 = vmatprep.subr.bf16.mxu0 %v2616_v7  ;;  %v3006_v52 = vld [vmem:[%s3326_s1 + $0xa8] sm:$0xff]   ;;  %v3013_v53 = vld [vmem:[%s3326_s1 + $0x198] sm:$0xff]   ;;  %v3020_v54 = vld [vmem:[%s3326_s1 + $0xb0] sm:$0xff]  }
  0x30   : > { %2202 = vmatprep.subr.bf16.mxu1 %v2616_v7  ;;  %v3027_v55 = vld [vmem:[%s3326_s1 + $0x1a0] sm:$0xff]   ;;  %v3034_v56 = vld [vmem:[%s3326_s1 + $0xb8] sm:$0xff]   ;;  %v3041_v57 = vld [vmem:[%s3326_s1 + $0x1a8] sm:$0xff]  }
  0x31   : > { %v3045_v58 = vld [vmem:[%s2733_s23 + $0x18] sm:$0xff]   ;;  %v3051_v59 = vld [vmem:[%s3326_s1 + $0xc0] sm:$0xff]   ;;  %v3058_v60 = vld [vmem:[%s3326_s1 + $0x1b0] sm:$0xff]  }
  0x32   : > { %2123 = vmatpush3.bf16.msra.mxu0 %v2739_v15  ;;  %v3069_v61 = vld [vmem:[%s3326_s1 + $0xc8] sm:$0xff]   ;;  %v3076_v62 = vld [vmem:[%s3326_s1 + $0x1b8] sm:$0xff]   ;;  %v3087_v63 = vld [vmem:[%s3326_s1 + $0xd0] sm:$0xff]  }
  0x33   : > { %2203 = vmatpush3.bf16.msra.mxu1 %v2746_v16  ;;  %2124 = vmatprep.subr.bf16.mxu0 %v2616_v7  ;;  %v3094_v0 = vld [vmem:[%s3326_s1 + $0x1c0] sm:$0xff]   ;;  %v3101_v1 = vld [vmem:[%s3326_s1 + $0xd8] sm:$0xff]   ;;  %v3108_v2 = vld [vmem:[%s3326_s1 + $0x1c8] sm:$0xff]  }
  0x34   : > { %2204 = vmatprep.subr.bf16.mxu1 %v2616_v7  ;;  %3330 = vst [vmem:[#allocation3_spill] sm:$0xff] %v3108_v2  ;;  %v3115_v3 = vld [vmem:[%s3326_s1 + $0xe0] sm:$0xff]   ;;  %v3122_v4 = vld [vmem:[%s3326_s1 + $0x1d0] sm:$0xff]   ;;  %v3129_v5 = vld [vmem:[%s3326_s1 + $0xe8] sm:$0xff]  }
  0x36   : > { %2125 = vmatpush3.bf16.msra.mxu0 %v2753_v17 }
  0x37   : > { %2205 = vmatpush3.bf16.msra.mxu1 %v2760_v18  ;;  %2130 = vmatprep.subr.bf16.mxu0 %v2616_v7 }
  0x38   : > { %2210 = vmatprep.subr.bf16.mxu1 %v2616_v7 }
  0x39   : > { %2127 = vmatmul.mubr.msk.bf16.vlgmr.msra.gmra.mrb[0].mxu0 %vm331_vm1, %v2764_v19 }
  0x3a   : > { %2131 = vmatpush3.bf16.msra.mxu0 %v2770_v20  ;;  %2207 = vmatmul.mubr.msk.bf16.vlgmr.msra.gmra.mrb[0].mxu1 %vm331_vm1, %v2764_v19 }
  0x3b   : > { %2211 = vmatpush3.bf16.msra.mxu1 %v2777_v21  ;;  %2132 = vmatprep.subr.bf16.mxu0 %v2616_v7 }
  0x3c   : > { %2212 = vmatprep.subr.bf16.mxu1 %v2616_v7  ;;  %2142 = vmatprep.mubr.msk.bf16.mxu0 %vm2617_vm0, %v2616_v7 }
  0x3d   : > { %2222 = vmatprep.mubr.msk.bf16.mxu1 %vm2617_vm0, %v2616_v7 }
  0x3e   : > { %2133 = vmatpush3.bf16.msra.mxu0 %v2788_v22 }
  0x3f   : > { %2213 = vmatpush3.bf16.msra.mxu1 %v2795_v23  ;;  %2134 = vmatprep.subr.bf16.mxu0 %v2616_v7 }
  0x40   : > { %2214 = vmatprep.subr.bf16.mxu1 %v2616_v7 }
  0x42   : > { %2135 = vmatpush3.bf16.msra.mxu0 %v2806_v24 }
  0x43   : > { %2215 = vmatpush3.bf16.msra.mxu1 %v2813_v25  ;;  %2136 = vmatprep.subr.bf16.mxu0 %v2616_v7 }
  0x44   : > { %2216 = vmatprep.subr.bf16.mxu1 %v2616_v7 }
  0x46   : > { %2137 = vmatpush3.bf16.msra.mxu0 %v2820_v26 }
  0x47   : > { %2217 = vmatpush3.bf16.msra.mxu1 %v2827_v27  ;;  %2138 = vmatprep.subr.bf16.mxu0 %v2616_v7 }
  0x48   : > { %2218 = vmatprep.subr.bf16.mxu1 %v2616_v7 }
  0x4a   : > { %2139 = vmatpush3.bf16.msra.mxu0 %v2834_v28 }
  0x4b   : > { %2219 = vmatpush3.bf16.msra.mxu1 %v2841_v29  ;;  %2140 = vmatprep.subr.bf16.mxu0 %v2616_v7 }
  0x4c   : > { %2220 = vmatprep.subr.bf16.mxu1 %v2616_v7 }
  0x4e   : > { %2141 = vmatpush3.bf16.msra.mxu0 %v2848_v30 }
  0x4f   : > { %2221 = vmatpush3.bf16.msra.mxu1 %v2855_v31  ;;  %2146 = vmatprep.subr.bf16.mxu0 %v2616_v7 }
  0x50   : > { %2226 = vmatprep.subr.bf16.mxu1 %v2616_v7 }
  0x51   : > { %2143 = vmatmul.mubr.msk.bf16.vlgmr.msra.gmra.mrb[0].mxu0 %vm331_vm1, %v2551_v32 }
  0x52   : > { %2147 = vmatpush3.bf16.msra.mxu0 %v2863_v33  ;;  %2223 = vmatmul.mubr.msk.bf16.vlgmr.msra.gmra.mrb[0].mxu1 %vm331_vm1, %v2551_v32  ;;  %v3136_v32 = vld [vmem:[%s3326_s1 + $0x1d8] sm:$0xff]  }
  0x53   : > { %2227 = vmatpush3.bf16.msra.mxu1 %v2870_v34  ;;  %2148 = vmatprep.subr.bf16.mxu0 %v2616_v7 }
  0x54   : > { %2228 = vmatprep.subr.bf16.mxu1 %v2616_v7  ;;  %2158 = vmatprep.mubr.msk.bf16.mxu0 %vm2617_vm0, %v2616_v7 }
  0x55   : > { %2238 = vmatprep.mubr.msk.bf16.mxu1 %vm2617_vm0, %v2616_v7 }
  0x56   : > { %2149 = vmatpush3.bf16.msra.mxu0 %v2879_v35 }
  0x57   : > { %2229 = vmatpush3.bf16.msra.mxu1 %v2886_v36  ;;  %2150 = vmatprep.subr.bf16.mxu0 %v2616_v7 }
  0x58   : > { %2230 = vmatprep.subr.bf16.mxu1 %v2616_v7 }
  0x5a   : > { %2151 = vmatpush3.bf16.msra.mxu0 %v2897_v37 }
  0x5b   : > { %2231 = vmatpush3.bf16.msra.mxu1 %v2904_v38  ;;  %2152 = vmatprep.subr.bf16.mxu0 %v2616_v7 }
  0x5c   : > { %2232 = vmatprep.subr.bf16.mxu1 %v2616_v7 }
  0x5e   : > { %2153 = vmatpush3.bf16.msra.mxu0 %v2911_v39 }
  0x5f   : > { %2233 = vmatpush3.bf16.msra.mxu1 %v2918_v40  ;;  %2154 = vmatprep.subr.bf16.mxu0 %v2616_v7 }
  0x60   : > { %2234 = vmatprep.subr.bf16.mxu1 %v2616_v7 }
  0x62   : > { %2155 = vmatpush3.bf16.msra.mxu0 %v2925_v41 }
  0x63   : > { %2235 = vmatpush3.bf16.msra.mxu1 %v2932_v42  ;;  %2156 = vmatprep.subr.bf16.mxu0 %v2616_v7 }
  0x64   : > { %2236 = vmatprep.subr.bf16.mxu1 %v2616_v7 }
  0x66   : > { %2157 = vmatpush3.bf16.msra.mxu0 %v2939_v43 }
  0x67   : > { %2237 = vmatpush3.bf16.msra.mxu1 %v2946_v44  ;;  %2162 = vmatprep.subr.bf16.mxu0 %v2616_v7 }
  0x68   : > { %2242 = vmatprep.subr.bf16.mxu1 %v2616_v7 }
  0x69   : > { %2159 = vmatmul.mubr.msk.bf16.vlgmr.msra.gmra.mrb[0].mxu0 %vm331_vm1, %v2950_v45 }
  0x6a   : > { %2163 = vmatpush3.bf16.msra.mxu0 %v2956_v46  ;;  %2239 = vmatmul.mubr.msk.bf16.vlgmr.msra.gmra.mrb[0].mxu1 %vm331_vm1, %v2950_v45 }
  0x6b   : > { %2243 = vmatpush3.bf16.msra.mxu1 %v2963_v47  ;;  %2164 = vmatprep.subr.bf16.mxu0 %v2616_v7 }
  0x6c   : > { %2244 = vmatprep.subr.bf16.mxu1 %v2616_v7  ;;  %2174 = vmatprep.mubr.msk.bf16.mxu0 %vm2617_vm0, %v2616_v7 }
  0x6d   : > { %2254 = vmatprep.mubr.msk.bf16.mxu1 %vm2617_vm0, %v2616_v7 }
  0x6e   : > { %2165 = vmatpush3.bf16.msra.mxu0 %v2974_v48 }
  0x6f   : > { %2245 = vmatpush3.bf16.msra.mxu1 %v2981_v49  ;;  %2166 = vmatprep.subr.bf16.mxu0 %v2616_v7 }
  0x70   : > { %2246 = vmatprep.subr.bf16.mxu1 %v2616_v7 }
  0x72   : > { %2167 = vmatpush3.bf16.msra.mxu0 %v2992_v50 }
  0x73   : > { %2247 = vmatpush3.bf16.msra.mxu1 %v2999_v51  ;;  %2168 = vmatprep.subr.bf16.mxu0 %v2616_v7 }
  0x74   : > { %2248 = vmatprep.subr.bf16.mxu1 %v2616_v7 }
  0x76   : > { %2169 = vmatpush3.bf16.msra.mxu0 %v3006_v52 }
  0x77   : > { %2249 = vmatpush3.bf16.msra.mxu1 %v3013_v53  ;;  %2170 = vmatprep.subr.bf16.mxu0 %v2616_v7 }
  0x78   : > { %2250 = vmatprep.subr.bf16.mxu1 %v2616_v7 }
  0x7a   : > { %2171 = vmatpush3.bf16.msra.mxu0 %v3020_v54 }
  0x7b   : > { %2251 = vmatpush3.bf16.msra.mxu1 %v3027_v55  ;;  %2172 = vmatprep.subr.bf16.mxu0 %v2616_v7 }
  0x7c   : > { %2252 = vmatprep.subr.bf16.mxu1 %v2616_v7 }
  0x7e   : > { %2173 = vmatpush3.bf16.msra.mxu0 %v3034_v56 }
  0x7f   : > { %2253 = vmatpush3.bf16.msra.mxu1 %v3041_v57  ;;  %2178 = vmatprep.subr.bf16.mxu0 %v2616_v7 }
  0x80   : > { %2258 = vmatprep.subr.bf16.mxu1 %v2616_v7 }
  0x81   : > { %2175 = vmatmul.mubr.msk.bf16.vlgmr.msra.gmra.mrb[0].mxu0 %vm331_vm1, %v3045_v58 }
  0x82   : > { %2179 = vmatpush3.bf16.msra.mxu0 %v3051_v59  ;;  %2255 = vmatmul.mubr.msk.bf16.vlgmr.msra.gmra.mrb[0].mxu1 %vm331_vm1, %v3045_v58 }
  0x83   : > { %2259 = vmatpush3.bf16.msra.mxu1 %v3058_v60  ;;  %2180 = vmatprep.subr.bf16.mxu0 %v2616_v7 }
  0x84   : > { %2260 = vmatprep.subr.bf16.mxu1 %v2616_v7  ;;  %2190 = vmatprep.mubr.msk.bf16.mxu0 %vm2617_vm0, %v2616_v7 }
  0x85   : > { %2270 = vmatprep.mubr.msk.bf16.mxu1 %vm2617_vm0, %v2616_v7 }
  0x86   : > { %2181 = vmatpush3.bf16.msra.mxu0 %v3069_v61 }
  0x87   : > { %2261 = vmatpush3.bf16.msra.mxu1 %v3076_v62  ;;  %2182 = vmatprep.subr.bf16.mxu0 %v2616_v7 }
  0x88   : > { %2262 = vmatprep.subr.bf16.mxu1 %v2616_v7 }
  0x8a   : > { %2183 = vmatpush3.bf16.msra.mxu0 %v3087_v63 }
  0x8b   : > { %2263 = vmatpush3.bf16.msra.mxu1 %v3094_v0  ;;  %2184 = vmatprep.subr.bf16.mxu0 %v2616_v7 }
  0x8c   : > { %2264 = vmatprep.subr.bf16.mxu1 %v2616_v7 }
  0x8e   : > { %2185 = vmatpush3.bf16.msra.mxu0 %v3101_v1 }
  0x8f   : > { %2265 = vmatpush3.bf16.msra.mxu1 %v3108_v2  ;;  %2186 = vmatprep.subr.bf16.mxu0 %v2616_v7  ;;  %v3140_v2 = vld [vmem:[%s2733_s23 + $0x20] sm:$0xff]  }
  0x90   : > { %2266 = vmatprep.subr.bf16.mxu1 %v2616_v7 }
  0x92   : > { %2187 = vmatpush3.bf16.msra.mxu0 %v3115_v3 }
  0x93   : > { %2267 = vmatpush3.bf16.msra.mxu1 %v3122_v4  ;;  %2188 = vmatprep.subr.bf16.mxu0 %v2616_v7 }
  0x94   : > { %2268 = vmatprep.subr.bf16.mxu1 %v2616_v7 }
  0x96   : > { %2189 = vmatpush3.bf16.msra.mxu0 %v3129_v5 }
  0x97   : > { %2269 = vmatpush3.bf16.msra.mxu1 %v3136_v32  ;;  %2274 = vmatprep.subr.bf16.mxu0 %v2616_v7 }
  0x98   : > { %2354 = vmatprep.subr.bf16.mxu1 %v2616_v7 }
  0x99   : > { %2191 = vmatmul.mubr.msk.bf16.vlgmr.msra.gmra.mrb[0].mxu0 %vm331_vm1, %v3140_v2 }
  0x9a   : > { %2271 = vmatmul.mubr.msk.bf16.vlgmr.msra.gmra.mrb[0].mxu1 %vm331_vm1, %v3140_v2  ;;  %2275 = vmatpush3.bf16.msra.mxu0 %v2677_v6  ;;  %v3331_v6 = vld [vmem:[#allocation3_spill] sm:$0xff] }
  0x9b   : > { %2355 = vmatpush3.bf16.msra.mxu1 %v2684_v8  ;;  %2276 = vmatprep.subr.bf16.mxu0 %v2616_v7  ;;  %v2591_v8 = vld [vmem:[%s2733_s23 + $0x28] sm:$0xff]   ;;  %s1755_s23 = sshll.u32 %s1748_s15, 1 }
  0x9c   : > { %2356 = vmatprep.subr.bf16.mxu1 %v2616_v7  ;;  %2286 = vmatprep.mubr.msk.bf16.mxu0 %vm2617_vm0, %v2616_v7  ;;  %p254_p8 = scmp.lt.s32.totalorder %s1755_s23, 3 }
  0x9d   : > { %2366 = vmatprep.mubr.msk.bf16.mxu1 %vm2617_vm0, %v2616_v7 }
  0x9e   : > { %2277 = vmatpush3.bf16.msra.mxu0 %v2690_v9  ;;  %s3336_s23 = smov (!%p254_p8, %s1755_s23), 3 }
  0x9f   : > { %2357 = vmatpush3.bf16.msra.mxu1 %v2699_v10  ;;  %2278 = vmatprep.subr.bf16.mxu0 %v2616_v7  ;;  %s1756_s14 = sshll.u32 %s3336_s23, 2 }
  0xa0   : > { %2358 = vmatprep.subr.bf16.mxu1 %v2616_v7  ;;  %s257_s26 = scalar_lea.vmem %s3328_s3, %s1756_s14 }
  0xa2   : > { %2279 = vmatpush3.bf16.msra.mxu0 %v2709_v11 }
  0xa3   : > { %2359 = vmatpush3.bf16.msra.mxu1 %v2716_v12  ;;  %2280 = vmatprep.subr.bf16.mxu0 %v2616_v7 }
  0xa4   : > { %2360 = vmatprep.subr.bf16.mxu1 %v2616_v7 }
  0xa6   : > { %2281 = vmatpush3.bf16.msra.mxu0 %v2723_v13 }
  0xa7   : > { %2361 = vmatpush3.bf16.msra.mxu1 %v2730_v14  ;;  %2282 = vmatprep.subr.bf16.mxu0 %v2616_v7 }
  0xa8   : > { %2362 = vmatprep.subr.bf16.mxu1 %v2616_v7 }
  0xaa   : > { %2283 = vmatpush3.bf16.msra.mxu0 %v2739_v15 }
  0xab   : > { %2363 = vmatpush3.bf16.msra.mxu1 %v2746_v16  ;;  %2284 = vmatprep.subr.bf16.mxu0 %v2616_v7 }
  0xac   : > { %2364 = vmatprep.subr.bf16.mxu1 %v2616_v7 }
  0xae   : > { %2285 = vmatpush3.bf16.msra.mxu0 %v2753_v17 }
  0xaf   : > { %2365 = vmatpush3.bf16.msra.mxu1 %v2760_v18  ;;  %2290 = vmatprep.subr.bf16.mxu0 %v2616_v7 }
  0xb0   : > { %2370 = vmatprep.subr.bf16.mxu1 %v2616_v7 }
  0xb1   : > { %2287 = vmatmul.mubr.msk.bf16.vlgmr.msra.gmra.mrb[4].mxu0 %vm331_vm1, %v2950_v45 }
  0xb2   : > { %2291 = vmatpush3.bf16.msra.mxu0 %v2770_v20  ;;  %2367 = vmatmul.mubr.msk.bf16.vlgmr.msra.gmra.mrb[4].mxu1 %vm331_vm1, %v2950_v45 }
  0xb3   : > { %2371 = vmatpush3.bf16.msra.mxu1 %v2777_v21  ;;  %2292 = vmatprep.subr.bf16.mxu0 %v2616_v7 }
  0xb4   : > { %2372 = vmatprep.subr.bf16.mxu1 %v2616_v7  ;;  %2302 = vmatprep.mubr.msk.bf16.mxu0 %vm2617_vm0, %v2616_v7 }
  0xb5   : > { %2382 = vmatprep.mubr.msk.bf16.mxu1 %vm2617_vm0, %v2616_v7 }
  0xb6   : > { %2293 = vmatpush3.bf16.msra.mxu0 %v2788_v22  ;;  %v1961_v22 = vld [vmem:[%s3327_s2] ss:$0 sm:$0xff] }
  0xb7   : > { %2373 = vmatpush3.bf16.msra.mxu1 %v2795_v23  ;;  %2294 = vmatprep.subr.bf16.mxu0 %v2616_v7 }
  0xb8   : > { %2374 = vmatprep.subr.bf16.mxu1 %v2616_v7 }
  0xba   : > { %2295 = vmatpush3.bf16.msra.mxu0 %v2806_v24 }
  0xbb   : > { %2375 = vmatpush3.bf16.msra.mxu1 %v2813_v25  ;;  %2296 = vmatprep.subr.bf16.mxu0 %v2616_v7 }
  0xbc   : > { %2376 = vmatprep.subr.bf16.mxu1 %v2616_v7 }
  0xbe   : > { %2297 = vmatpush3.bf16.msra.mxu0 %v2820_v26 }
  0xbf   : > { %2377 = vmatpush3.bf16.msra.mxu1 %v2827_v27  ;;  %2298 = vmatprep.subr.bf16.mxu0 %v2616_v7 }
  0xc0   : > { %2378 = vmatprep.subr.bf16.mxu1 %v2616_v7 }
  0xc2   : > { %2299 = vmatpush3.bf16.msra.mxu0 %v2834_v28 }
  0xc3   : > { %2379 = vmatpush3.bf16.msra.mxu1 %v2841_v29  ;;  %2300 = vmatprep.subr.bf16.mxu0 %v2616_v7 }
  0xc4   : > { %2380 = vmatprep.subr.bf16.mxu1 %v2616_v7 }
  0xc6   : > { %2301 = vmatpush3.bf16.msra.mxu0 %v2848_v30 }
  0xc7   : > { %2381 = vmatpush3.bf16.msra.mxu1 %v2855_v31  ;;  %2306 = vmatprep.subr.bf16.mxu0 %v2616_v7 }
  0xc8   : > { %2386 = vmatprep.subr.bf16.mxu1 %v2616_v7 }
  0xc9   : > { %2303 = vmatmul.mubr.msk.bf16.vlgmr.msra.gmra.mrb[4].mxu0 %vm331_vm1, %v2764_v19 }
  0xca   : > { %2307 = vmatpush3.bf16.msra.mxu0 %v2863_v33  ;;  %2383 = vmatmul.mubr.msk.bf16.vlgmr.msra.gmra.mrb[4].mxu1 %vm331_vm1, %v2764_v19 }
  0xcb   : > { %2387 = vmatpush3.bf16.msra.mxu1 %v2870_v34  ;;  %2308 = vmatprep.subr.bf16.mxu0 %v2616_v7 }
  0xcc   : > { %2388 = vmatprep.subr.bf16.mxu1 %v2616_v7  ;;  %2318 = vmatprep.mubr.msk.bf16.mxu0 %vm2617_vm0, %v2616_v7 }
  0xcd   : > { %2398 = vmatprep.mubr.msk.bf16.mxu1 %vm2617_vm0, %v2616_v7 }
  0xce   : > { %2309 = vmatpush3.bf16.msra.mxu0 %v2879_v35 }
  0xcf   : > { %2389 = vmatpush3.bf16.msra.mxu1 %v2886_v36  ;;  %2310 = vmatprep.subr.bf16.mxu0 %v2616_v7 }
  0xd0   : > { %2390 = vmatprep.subr.bf16.mxu1 %v2616_v7 }
  0xd2   : > { %2311 = vmatpush3.bf16.msra.mxu0 %v2897_v37 }
  0xd3   : > { %2391 = vmatpush3.bf16.msra.mxu1 %v2904_v38  ;;  %2312 = vmatprep.subr.bf16.mxu0 %v2616_v7 }
  0xd4   : > { %2392 = vmatprep.subr.bf16.mxu1 %v2616_v7 }
  0xd6   : > { %2313 = vmatpush3.bf16.msra.mxu0 %v2911_v39 }
  0xd7   : > { %2393 = vmatpush3.bf16.msra.mxu1 %v2918_v40  ;;  %2314 = vmatprep.subr.bf16.mxu0 %v2616_v7 }
  0xd8   : > { %2394 = vmatprep.subr.bf16.mxu1 %v2616_v7 }
  0xda   : > { %2315 = vmatpush3.bf16.msra.mxu0 %v2925_v41 }
  0xdb   : > { %2395 = vmatpush3.bf16.msra.mxu1 %v2932_v42  ;;  %2316 = vmatprep.subr.bf16.mxu0 %v2616_v7 }
  0xdc   : > { %2396 = vmatprep.subr.bf16.mxu1 %v2616_v7 }
  0xde   : > { %2317 = vmatpush3.bf16.msra.mxu0 %v2939_v43 }
  0xdf   : > { %2397 = vmatpush3.bf16.msra.mxu1 %v2946_v44  ;;  %2322 = vmatprep.subr.bf16.mxu0 %v2616_v7 }
  0xe0   : > { %2402 = vmatprep.subr.bf16.mxu1 %v2616_v7 }
  0xe1   : > { %2319 = vmatmul.mubr.msk.bf16.vlgmr.msra.gmra.mrb[4].mxu0 %vm331_vm1, %v3045_v58 }
  0xe2   : > { %2323 = vmatpush3.bf16.msra.mxu0 %v2956_v46  ;;  %2399 = vmatmul.mubr.msk.bf16.vlgmr.msra.gmra.mrb[4].mxu1 %vm331_vm1, %v3045_v58 }
  0xe3   : > { %2403 = vmatpush3.bf16.msra.mxu1 %v2963_v47  ;;  %2324 = vmatprep.subr.bf16.mxu0 %v2616_v7 }
  0xe4   : > { %2404 = vmatprep.subr.bf16.mxu1 %v2616_v7  ;;  %2334 = vmatprep.mubr.msk.bf16.mxu0 %vm2617_vm0, %v2616_v7 }
  0xe5   : > { %2414 = vmatprep.mubr.msk.bf16.mxu1 %vm2617_vm0, %v2616_v7 }
  0xe6   : > { %2325 = vmatpush3.bf16.msra.mxu0 %v2974_v48 }
  0xe7   : > { %2405 = vmatpush3.bf16.msra.mxu1 %v2981_v49  ;;  %2326 = vmatprep.subr.bf16.mxu0 %v2616_v7 }
  0xe8   : > { %2406 = vmatprep.subr.bf16.mxu1 %v2616_v7 }
  0xea   : > { %2327 = vmatpush3.bf16.msra.mxu0 %v2992_v50 }
  0xeb   : > { %2407 = vmatpush3.bf16.msra.mxu1 %v2999_v51  ;;  %2328 = vmatprep.subr.bf16.mxu0 %v2616_v7 }
  0xec   : > { %2408 = vmatprep.subr.bf16.mxu1 %v2616_v7 }
  0xee   : > { %2329 = vmatpush3.bf16.msra.mxu0 %v3006_v52 }
  0xef   : > { %2409 = vmatpush3.bf16.msra.mxu1 %v3013_v53  ;;  %2330 = vmatprep.subr.bf16.mxu0 %v2616_v7 }
  0xf0   : > { %2410 = vmatprep.subr.bf16.mxu1 %v2616_v7 }
  0xf2   : > { %2331 = vmatpush3.bf16.msra.mxu0 %v3020_v54 }
  0xf3   : > { %2411 = vmatpush3.bf16.msra.mxu1 %v3027_v55  ;;  %2332 = vmatprep.subr.bf16.mxu0 %v2616_v7 }
  0xf4   : > { %2412 = vmatprep.subr.bf16.mxu1 %v2616_v7 }
  0xf6   : > { %2333 = vmatpush3.bf16.msra.mxu0 %v3034_v56 }
  0xf7   : > { %2413 = vmatpush3.bf16.msra.mxu1 %v3041_v57  ;;  %2338 = vmatprep.subr.bf16.mxu0 %v2616_v7 }
  0xf8   : > { %2418 = vmatprep.subr.bf16.mxu1 %v2616_v7 }
  0xf9   : > { %2335 = vmatmul.mubr.msk.bf16.vlgmr.msra.gmra.mrb[4].mxu0 %vm331_vm1, %v3140_v2 }
  0xfa   : > { %2339 = vmatpush3.bf16.msra.mxu0 %v3051_v59  ;;  %2415 = vmatmul.mubr.msk.bf16.vlgmr.msra.gmra.mrb[4].mxu1 %vm331_vm1, %v3140_v2 }
  0xfb   : > { %2419 = vmatpush3.bf16.msra.mxu1 %v3058_v60  ;;  %2340 = vmatprep.subr.bf16.mxu0 %v2616_v7 }
  0xfc   : > { %2420 = vmatprep.subr.bf16.mxu1 %v2616_v7  ;;  %2350 = vmatprep.mubr.msk.bf16.mxu0 %vm2617_vm0, %v2616_v7 }
  0xfd   : > { %2430 = vmatprep.mubr.msk.bf16.mxu1 %vm2617_vm0, %v2616_v7 }
  0xfe   : > { %2341 = vmatpush3.bf16.msra.mxu0 %v3069_v61 }
  0xff   : > { %2421 = vmatpush3.bf16.msra.mxu1 %v3076_v62  ;;  %2342 = vmatprep.subr.bf16.mxu0 %v2616_v7 }
 0x100   : > { %2422 = vmatprep.subr.bf16.mxu1 %v2616_v7 }
 0x102   : > { %2343 = vmatpush3.bf16.msra.mxu0 %v3087_v63 }
 0x103   : > { %2423 = vmatpush3.bf16.msra.mxu1 %v3094_v0  ;;  %2344 = vmatprep.subr.bf16.mxu0 %v2616_v7 }
 0x104   : > { %2424 = vmatprep.subr.bf16.mxu1 %v2616_v7 }
 0x106   : > { %2345 = vmatpush3.bf16.msra.mxu0 %v3101_v1 }
 0x107   : > { %2425 = vmatpush3.bf16.msra.mxu1 %v3331_v6  ;;  %2346 = vmatprep.subr.bf16.mxu0 %v2616_v7 }
 0x108   : > { %2426 = vmatprep.subr.bf16.mxu1 %v2616_v7 }
 0x10a   : > { %2347 = vmatpush3.bf16.msra.mxu0 %v3115_v3 }
 0x10b   : > { %2427 = vmatpush3.bf16.msra.mxu1 %v3122_v4  ;;  %2348 = vmatprep.subr.bf16.mxu0 %v2616_v7 }
 0x10c   : > { %2428 = vmatprep.subr.bf16.mxu1 %v2616_v7 }
 0x10e   : > { %2349 = vmatpush3.bf16.msra.mxu0 %v3129_v5 }
 0x10f   : > { %2429 = vmatpush3.bf16.msra.mxu1 %v3136_v32 }
 0x111   : > { %2351 = vmatmul.mubr.msk.bf16.vlgmr.msra.gmra.mrb[4].mxu0 %vm331_vm1, %v2591_v8 }
 0x112   : > { %2431 = vmatmul.mubr.msk.bf16.vlgmr.msra.gmra.mrb[4].mxu1 %vm331_vm1, %v2591_v8 }
 0x16c   : > { %v761_v9 = vpop.f32.mrb[0].mxu0 }
 0x16d   : > { %v1217_v10 = vpop.f32.mrb[0].mxu1  ;;  %v2192_v11 = vpop.f32.mrb[1].mxu0 }
 0x16e   : > { %v1226_v12 = vmax.f32 %v761_v9, %v1217_v10  ;;  %v2272_v13 = vpop.f32.mrb[1].mxu1  ;;  %v764_v14 = vpop.f32.mrb[2].mxu0 }
 0x16f   : > { %v1220_v15 = vpop.f32.mrb[2].mxu1  ;;  %v2193_v16 = vpop.f32.mrb[3].mxu0 }
 0x170   : > { %v1227_v17 = vmax.f32 %v764_v14, %v1220_v15  ;;  %v2273_v7 = vpop.f32.mrb[3].mxu1 }
 0x1e4   : > { %v1441_v18 = vpop.f32.mrb[4].mxu0 }
 0x1e5   : > { %v1450_v19 = vmax.f32 %v1226_v12, %v1441_v18  ;;  %v1654_v20 = vpop.f32.mrb[4].mxu1  ;;  %v2352_v21 = vpop.f32.mrb[5].mxu0 }
 0x1e6   : > { %v2432_v23 = vpop.f32.mrb[5].mxu1  ;;  %v1444_v24 = vpop.f32.mrb[6].mxu0 }
 0x1e7   : > { %v1663_v25 = vmax.f32 %v1450_v19, %v1654_v20  ;;  %v1451_v26 = vmax.f32 %v1227_v17, %v1444_v24  ;;  %v1657_v27 = vpop.f32.mrb[6].mxu1  ;;  %v2353_v28 = vpop.f32.mrb[7].mxu0 }
 0x1e8   : > { %v2433_v29 = vpop.f32.mrb[7].mxu1 }
 0x1e9   : > { %v1672_v30 = vadd.f32 %v1961_v22, %v1663_v25  ;;  %v1664_v31 = vmax.f32 %v1451_v26, %v1657_v27 }
 0x1eb   : > { %v1673_v33 = vadd.f32 %v1961_v22, %v1664_v31  ;;  %v1674_v34 = vmax.f32 %v1672_v30, 0.0 }
 0x1ed   : > { %v1675_v35 = vmax.f32 %v1673_v33, 0.0 }
 0x1ef   : > { %v1972_v36 = vpack.c.bf16 %v1675_v35, %v1674_v34 }
 0x1f1   : > { %1973 = vst [vmem:[%s257_s26] sm:$0xff] %v1972_v36  }
 0x1f2 PF: > { %p10_p9 = scmp.ge.s32.totalorder %s2655_s16, 4   ;;  %s3332_s12 = smov %s2610_s13 }
 0x1f3   : > { %s3333_s13 = smov %s2664_s19  ;;  %s3334_s14 = smov %s2655_s16 }
 0x1f4   :  { %12 = sbr.rel (!%p10_p9) target bundleno = 2 (0x2), region = 122 }

// kernel: net_forward.4
= control target key start
LH: loop header
LB: loop body
LE: loop exit
PB: predicated region body
PF: predicated region fallthrough
CT: control target
= control target key end

     0   :  { %s2478_s12 = smov 0   ;;  %s2480_s13 = smov 0   ;;  %s3177_s0 = inlined_call_operand.vmem [shape: bf16[6,16,84], index: 0, kind: input, shape index: {}]   ;;  %s3178_s1 = inlined_call_operand.vmem [shape: bf16[2,5,84,128], index: 1, kind: input, shape index: {}]   ;;  %s3179_s2 = inlined_call_operand.vmem [shape: f32[1,128], index: 2, kind: input, shape index: {}]   ;;  %s3180_s3 = inlined_call_operand.vmem [shape: bf16[16,128], index: 3, kind: output, shape index: {}]  }
   0x1   :  { %s2482_s14 = smov 0  }
   0x2 LB: > { %s1626_s15 = sadd.s32 4294967295, %s2454_s14   ;;  %s2495_s16 = sadd.s32 1, %s2454_s14   ;;  %s2454_s14 = sphi %s2482_s14, %s3192_s14   ;;  %s2450_s13 = sphi %s2480_s13, %s3191_s13   ;;  %s2446_s12 = sphi %s2478_s12, %s3190_s12  }
   0x3   : > { %s17_s17 = ssub.s32 %s2454_s14, %s2495_s16  ;;  %s20_s18 = sadd.s32 1, %s2450_s13 }
   0x4   : > { %p18_p0 = scmp.eq.s32.totalorder %s17_s17, 0  ;;  %p27_p1 = scmp.ne.s32.totalorder %s2450_s13, %s2446_s12 }
   0x5   : > { %p28_p2 = scmp.eq.s32.totalorder %s2454_s14, 0  ;;  %p1629_p4 = scmp.ge.s32.totalorder %s2454_s14, 2 }
   0x6   : > { %s2504_s19 = scalar_select %p18_p0, %s2450_s13, %s20_s18  }
   0x7   : > { %p29_p3 = por %p28_p2, %p27_p1  ;;  %127 = sbr.rel (%p1629_p4) target bundleno = 22 (0x16), region = 24 }
   0xe   : > { %130 = sbr.rel (!%p29_p3) target bundleno = 22 (0x16), region = 28  ;;  %s132_s20 = sand.u32 (%p29_p3), 1, %s2450_s13  }
   0xf   : > { %s1630_s21 = sshll.u32 (%p29_p3), %s2454_s14, 2  ;;  %s2344_s22 = smul.u32 (%p29_p3), 24, %s132_s20 }
  0x10   : > { %s136_s25 = scalar_lea.vmem (%p29_p3), %s3177_s0, %s1630_s21 }
  0x11   : > { %v152_v0 = vld [vmem:[%s136_s25] sm:$0xf] (%p29_p3)  ;;  %v154_v1 = vld [vmem:[%s136_s25 + $0x8] sm:$0xf] (%p29_p3)  ;;  %v156_v2 = vld [vmem:[%s136_s25 + $0x10] sm:$0xf] (%p29_p3) }
  0x12   : > { %v158_v3 = vld [vmem:[%s136_s25 + $0x18] sm:$0xf] (%p29_p3)  ;;  %v160_v4 = vld [vmem:[%s136_s25 + $0x20] sm:$0xf] (%p29_p3)  ;;  %s134_s26 = scalar_lea.vmem (%p29_p3), [#allocation2], %s2344_s22 }
  0x13   : > { %153 = vst [vmem:[%s134_s26] sm:$0xf] (%p29_p3), %v152_v0  ;;  %155 = vst [vmem:[%s134_s26 + $0x4] sm:$0xf] (%p29_p3), %v154_v1  ;;  %v162_v5 = vld [vmem:[%s136_s25 + $0x28] sm:$0xf] (%p29_p3) }
  0x14   : > { %157 = vst [vmem:[%s134_s26 + $0x8] sm:$0xf] (%p29_p3), %v156_v2  ;;  %159 = vst [vmem:[%s134_s26 + $0xc] sm:$0xf] (%p29_p3), %v158_v3 }
  0x15   : > { %161 = vst [vmem:[%s134_s26 + $0x10] sm:$0xf] %v160_v4  ;;  %163 = vst [vmem:[%s134_s26 + $0x14] sm:$0xf] %v162_v5 }
  0x16 PF: > { %p1631_p5 = scmp.ge.s32.totalorder %s2454_s14, 1  ;;  %p197_p6 = scmp.lt.s32.totalorder %s2454_s14, 3 }
  0x18   : > { %p198_p7 = pnand %p1631_p5, %p197_p6 }
  0x1a   : > { %201 = sbr.rel (%p198_p7) target bundleno = 497 (0x1f1), region = 69 }
  0x21   : > { %v2517_v6 = vld [vmem:[%s3178_s1 + $0x2c] sm:$0xff]   ;;  %v2456_v7 = vmov 0.0   ;;  %v2530_v9 = vld [vmem:[%s3178_s1 + $0x34] sm:$0xff]   ;;  %vm2457_vm0 = vmmov 0   ;;  %v2548_v11 = vld [vmem:[%s3178_s1 + $0x3c] sm:$0xff]   ;;  %s204_s20 = sand.u32 1, %s2446_s12  }
  0x22   : > { %1960 = vmatprep.subr.bf16.mxu0 %v2456_v7  ;;  %2040 = vmatprep.subr.bf16.mxu1 %v2456_v7  ;;  %v2524_v8 = vld [vmem:[%s3178_s1 + $0x108] sm:$0xff]   ;;  %v2537_v10 = vld [vmem:[%s3178_s1 + $0x110] sm:$0xff]   ;;  %v2555_v12 = vld [vmem:[%s3178_s1 + $0x118] sm:$0xff]   ;;  %s2345_s28 = smul.u32 24, %s204_s20  ;;  %vm294_vm1 = vcmask 1041408   ;;  %vm290_vm2 = vcmask 687104  }
  0x23   : > { %1961 = vmatpush3.bf16.msra.mxu0 %v2517_v6  ;;  %2041 = vmatpush3.bf16.msra.mxu1 %v2524_v8  ;;  %v2562_v13 = vld [vmem:[%s3178_s1 + $0x44] sm:$0xff]   ;;  %v2576_v15 = vld [vmem:[%s3178_s1 + $0x4c] sm:$0xff]   ;;  %v2382_v17 = vld [vmem:[%s3178_s1 + $0x54] ss:$0 sps:$4 sm:$0x33]   ;;  %p226_p8 = scmp.lt.s32.totalorder %s1626_s15, 1 }
  0x24   : > { %1962 = vmatprep.subr.bf16.mxu0 %v2456_v7  ;;  %2042 = vmatprep.subr.bf16.mxu1 %v2456_v7  ;;  %v2570_v14 = vld [vmem:[%s3178_s1 + $0x120] sm:$0xff]   ;;  %v2581_v16 = vld [vmem:[%s3178_s1 + $0x128] sm:$0xff]   ;;  %v2383_v18 = vld [vmem:[%s3178_s1 + $0x130] ss:$0 sps:$4 sm:$0x33]   ;;  %v2597_v19 = vsel %vm294_vm1, %v2382_v17, 0 }
  0x25   : > { %1972 = vmatprep.mubr.msk.bf16.mxu0 %vm2457_vm0, %v2456_v7  ;;  %2052 = vmatprep.mubr.msk.bf16.mxu1 %vm2457_vm0, %v2456_v7  ;;  %v2601_v20 = vsel %vm294_vm1, %v2383_v18, 0  ;;  %s2604_s4 = scalar_lea.vmem [#allocation2], %s2345_s28  ;;  %v2612_v22 = vld [vmem:[%s3178_s1] sm:$0xff]   ;;  %v2625_v24 = vld [vmem:[%s3178_s1 + $0x8] sm:$0xff]   ;;  %v2648_v26 = vld [vmem:[%s3178_s1 + $0x10] sm:$0xff]   ;;  %s3194_s15 = smov (!%p226_p8, %s1626_s15), 1 }
  0x26   : > { %v2607_v21 = vld [vmem:[%s2604_s4 + $0x4] sm:$0xf]  ;;  %v2655_v27 = vld [vmem:[%s3178_s1 + $0xec] sm:$0xff]   ;;  %v2669_v29 = vld [vmem:[%s3178_s1 + $0xf4] sm:$0xff]   ;;  %s1632_s24 = sshll.u32 %s3194_s15, 2 }
  0x27   : > { %1963 = vmatpush3.bf16.msra.mxu0 %v2530_v9  ;;  %2043 = vmatpush3.bf16.msra.mxu1 %v2537_v10  ;;  %v2619_v23 = vld [vmem:[%s3178_s1 + $0xdc] sm:$0xff]   ;;  %v2632_v25 = vld [vmem:[%s3178_s1 + $0xe4] sm:$0xff]   ;;  %v2714_v38 = vld [vmem:[%s3178_s1 + $0x134] sm:$0xff]   ;;  %s229_s14 = scalar_lea.vmem %s3180_s3, %s1632_s24 }
  0x28   : > { %1964 = vmatprep.subr.bf16.mxu0 %v2456_v7  ;;  %2044 = vmatprep.subr.bf16.mxu1 %v2456_v7  ;;  %v2662_v28 = vld [vmem:[%s3178_s1 + $0x18] sm:$0xff]   ;;  %v2394_v30 = vld [vmem:[%s3178_s1 + $0x28] ss:$0 sps:$4 sm:$0x33]   ;;  %v2679_v31 = vld [vmem:[%s3178_s1 + $0x20] sm:$0xff]  }
  0x29   : > { %v2395_v32 = vld [vmem:[%s3178_s1 + $0x104] ss:$0 sps:$4 sm:$0x33]   ;;  %v2689_v33 = vld [vmem:[%s3178_s1 + $0xfc] sm:$0xff]   ;;  %v2696_v34 = vsel %vm294_vm1, %v2394_v30, 0  ;;  %v2741_v41 = vld [vmem:[%s3178_s1 + $0x68] sm:$0xff]  }
  0x2a   : > { %v2700_v35 = vsel %vm294_vm1, %v2395_v32, 0  ;;  %v231_v36 = vld [vmem:[%s2604_s4] sm:$0xf]  ;;  %v2748_v42 = vld [vmem:[%s3178_s1 + $0x144] sm:$0xff]   ;;  %v2755_v43 = vld [vmem:[%s3178_s1 + $0x70] sm:$0xff]  }
  0x2b   : > { %1965 = vmatpush3.bf16.msra.mxu0 %v2548_v11  ;;  %2045 = vmatpush3.bf16.msra.mxu1 %v2555_v12  ;;  %v2707_v37 = vld [vmem:[%s3178_s1 + $0x58] sm:$0xff]   ;;  %v2720_v39 = vld [vmem:[%s3178_s1 + $0x60] sm:$0xff]   ;;  %v2762_v44 = vld [vmem:[%s3178_s1 + $0x14c] sm:$0xff]  }
  0x2c   : > { %1966 = vmatprep.subr.bf16.mxu0 %v2456_v7  ;;  %2046 = vmatprep.subr.bf16.mxu1 %v2456_v7  ;;  %v2730_v40 = vld [vmem:[%s3178_s1 + $0x13c] sm:$0xff]   ;;  %v2776_v46 = vld [vmem:[%s3178_s1 + $0x154] sm:$0xff]   ;;  %v2802_v52 = vld [vmem:[%s3178_s1 + $0x84] sm:$0xff]  }
  0x2d   : > { %v2769_v45 = vld [vmem:[%s3178_s1 + $0x78] sm:$0xff]   ;;  %v2406_v47 = vld [vmem:[%s3178_s1 + $0x80] ss:$0 sps:$4 sm:$0x33]   ;;  %v2820_v54 = vld [vmem:[%s3178_s1 + $0x8c] sm:$0xff]  }
  0x2e   : > { %v2407_v48 = vld [vmem:[%s3178_s1 + $0x15c] ss:$0 sps:$4 sm:$0x33]   ;;  %v2789_v49 = vsel %vm294_vm1, %v2406_v47, 0  ;;  %v2797_v51 = vld [vmem:[%s2604_s4 + $0x8] sm:$0xf] }
  0x2f   : > { %1967 = vmatpush3.bf16.msra.mxu0 %v2562_v13  ;;  %2047 = vmatpush3.bf16.msra.mxu1 %v2570_v14  ;;  %v2793_v50 = vsel %vm294_vm1, %v2407_v48, 0  ;;  %v2809_v53 = vld [vmem:[%s3178_s1 + $0x160] sm:$0xff]   ;;  %v2827_v55 = vld [vmem:[%s3178_s1 + $0x168] sm:$0xff]   ;;  %v2838_v56 = vld [vmem:[%s3178_s1 + $0x94] sm:$0xff]  }
  0x30   : > { %1968 = vmatprep.subr.bf16.mxu0 %v2456_v7  ;;  %2048 = vmatprep.subr.bf16.mxu1 %v2456_v7  ;;  %v2845_v57 = vld [vmem:[%s3178_s1 + $0x170] sm:$0xff]   ;;  %v2852_v58 = vld [vmem:[%s3178_s1 + $0x9c] sm:$0xff]   ;;  %v2866_v60 = vld [vmem:[%s3178_s1 + $0xa4] sm:$0xff]  }
  0x31   : > { %v2859_v59 = vld [vmem:[%s3178_s1 + $0x178] sm:$0xff]   ;;  %v2873_v61 = vld [vmem:[%s3178_s1 + $0x180] sm:$0xff]   ;;  %v2418_v62 = vld [vmem:[%s3178_s1 + $0xac] ss:$0 sps:$4 sm:$0x33]  }
  0x32   : > { %v2419_v63 = vld [vmem:[%s3178_s1 + $0x188] ss:$0 sps:$4 sm:$0x33]   ;;  %v2886_v0 = vsel %vm294_vm1, %v2418_v62, 0  ;;  %v2894_v2 = vld [vmem:[%s2604_s4 + $0xc] sm:$0xf] }
  0x33   : > { %1969 = vmatpush3.bf16.msra.mxu0 %v2576_v15  ;;  %2049 = vmatpush3.bf16.msra.mxu1 %v2581_v16  ;;  %v2890_v1 = vsel %vm294_vm1, %v2419_v63, 0  ;;  %v2899_v3 = vld [vmem:[%s3178_s1 + $0xb0] sm:$0xff]   ;;  %v2917_v5 = vld [vmem:[%s3178_s1 + $0xb8] sm:$0xff]   ;;  %v2935_v18 = vld [vmem:[%s3178_s1 + $0xc0] sm:$0xff]  }
  0x34   : > { %1970 = vmatprep.subr.bf16.mxu0 %v2456_v7  ;;  %2050 = vmatprep.subr.bf16.mxu1 %v2456_v7  ;;  %v2906_v4 = vld [vmem:[%s3178_s1 + $0x18c] sm:$0xff]   ;;  %v2924_v17 = vld [vmem:[%s3178_s1 + $0x194] sm:$0xff]   ;;  %v2942_v30 = vld [vmem:[%s3178_s1 + $0x19c] sm:$0xff]  }
  0x35   : > { %3184 = vst [vmem:[#allocation3_spill] sm:$0xff] %v2942_v30  ;;  %v2949_v32 = vld [vmem:[%s3178_s1 + $0xc8] sm:$0xff]   ;;  %v2963_v47 = vld [vmem:[%s3178_s1 + $0xd0] sm:$0xff]   ;;  %v2430_v62 = vld [vmem:[%s3178_s1 + $0xd8] ss:$0 sps:$4 sm:$0x33]  }
  0x36   : > { %3185 = vst [vmem:[#allocation4_spill] sm:$0xff] %v2949_v32  ;;  %v2970_v48 = vld [vmem:[%s3178_s1 + $0x1ac] sm:$0xff]   ;;  %v2431_v63 = vld [vmem:[%s3178_s1 + $0x1b4] ss:$0 sps:$4 sm:$0x33]  }
  0x37   : > { %1971 = vmatpush3.bf16.msra.mxu0 %v2597_v19  ;;  %2051 = vmatpush3.bf16.msra.mxu1 %v2601_v20 }
  0x38   : > { %1976 = vmatprep.subr.bf16.mxu0 %v2456_v7  ;;  %2056 = vmatprep.subr.bf16.mxu1 %v2456_v7 }
  0x3a   : > { %1973 = vmatmul.mubr.msk.bf16.vlgmr.msra.gmra.mrb[0].mxu0 %vm290_vm2, %v2607_v21  ;;  %2053 = vmatmul.mubr.msk.bf16.vlgmr.msra.gmra.mrb[0].mxu1 %vm290_vm2, %v2607_v21 }
  0x3b   : > { %1977 = vmatpush3.bf16.msra.mxu0 %v2612_v22  ;;  %2057 = vmatpush3.bf16.msra.mxu1 %v2619_v23 }
  0x3c   : > { %1978 = vmatprep.subr.bf16.mxu0 %v2456_v7  ;;  %2058 = vmatprep.subr.bf16.mxu1 %v2456_v7 }
  0x3d   : > { %1988 = vmatprep.mubr.msk.bf16.mxu0 %vm2457_vm0, %v2456_v7  ;;  %2068 = vmatprep.mubr.msk.bf16.mxu1 %vm2457_vm0, %v2456_v7 }
  0x3f   : > { %1979 = vmatpush3.bf16.msra.mxu0 %v2625_v24  ;;  %2059 = vmatpush3.bf16.msra.mxu1 %v2632_v25 }
  0x40   : > { %1980 = vmatprep.subr.bf16.mxu0 %v2456_v7  ;;  %2060 = vmatprep.subr.bf16.mxu1 %v2456_v7 }
  0x43   : > { %1981 = vmatpush3.bf16.msra.mxu0 %v2648_v26  ;;  %2061 = vmatpush3.bf16.msra.mxu1 %v2655_v27 }
  0x44   : > { %1982 = vmatprep.subr.bf16.mxu0 %v2456_v7  ;;  %2062 = vmatprep.subr.bf16.mxu1 %v2456_v7 }
  0x47   : > { %1983 = vmatpush3.bf16.msra.mxu0 %v2662_v28  ;;  %2063 = vmatpush3.bf16.msra.mxu1 %v2669_v29 }
  0x48   : > { %1984 = vmatprep.subr.bf16.mxu0 %v2456_v7  ;;  %2064 = vmatprep.subr.bf16.mxu1 %v2456_v7 }
  0x4b   : > { %1985 = vmatpush3.bf16.msra.mxu0 %v2679_v31  ;;  %2065 = vmatpush3.bf16.msra.mxu1 %v2689_v33 }
  0x4c   : > { %1986 = vmatprep.subr.bf16.mxu0 %v2456_v7  ;;  %2066 = vmatprep.subr.bf16.mxu1 %v2456_v7 }
  0x4f   : > { %1987 = vmatpush3.bf16.msra.mxu0 %v2696_v34  ;;  %2067 = vmatpush3.bf16.msra.mxu1 %v2700_v35 }
  0x50   : > { %1992 = vmatprep.subr.bf16.mxu0 %v2456_v7  ;;  %2072 = vmatprep.subr.bf16.mxu1 %v2456_v7 }
  0x52   : > { %1989 = vmatmul.mubr.msk.bf16.vlgmr.msra.gmra.mrb[0].mxu0 %vm290_vm2, %v231_v36  ;;  %2069 = vmatmul.mubr.msk.bf16.vlgmr.msra.gmra.mrb[0].mxu1 %vm290_vm2, %v231_v36  ;;  %v2956_v36 = vld [vmem:[%s3178_s1 + $0x1a4] sm:$0xff]  }
  0x53   : > { %1993 = vmatpush3.bf16.msra.mxu0 %v2707_v37  ;;  %2073 = vmatpush3.bf16.msra.mxu1 %v2714_v38  ;;  %3186 = vst [vmem:[#allocation5_spill] sm:$0xff] %v2956_v36 }
  0x54   : > { %1994 = vmatprep.subr.bf16.mxu0 %v2456_v7  ;;  %2074 = vmatprep.subr.bf16.mxu1 %v2456_v7 }
  0x55   : > { %2004 = vmatprep.mubr.msk.bf16.mxu0 %vm2457_vm0, %v2456_v7  ;;  %2084 = vmatprep.mubr.msk.bf16.mxu1 %vm2457_vm0, %v2456_v7 }
  0x57   : > { %1995 = vmatpush3.bf16.msra.mxu0 %v2720_v39  ;;  %2075 = vmatpush3.bf16.msra.mxu1 %v2730_v40 }
  0x58   : > { %1996 = vmatprep.subr.bf16.mxu0 %v2456_v7  ;;  %2076 = vmatprep.subr.bf16.mxu1 %v2456_v7 }
  0x5b   : > { %1997 = vmatpush3.bf16.msra.mxu0 %v2741_v41  ;;  %2077 = vmatpush3.bf16.msra.mxu1 %v2748_v42 }
  0x5c   : > { %1998 = vmatprep.subr.bf16.mxu0 %v2456_v7  ;;  %2078 = vmatprep.subr.bf16.mxu1 %v2456_v7 }
  0x5f   : > { %1999 = vmatpush3.bf16.msra.mxu0 %v2755_v43  ;;  %2079 = vmatpush3.bf16.msra.mxu1 %v2762_v44 }
  0x60   : > { %2000 = vmatprep.subr.bf16.mxu0 %v2456_v7  ;;  %2080 = vmatprep.subr.bf16.mxu1 %v2456_v7 }
  0x63   : > { %2001 = vmatpush3.bf16.msra.mxu0 %v2769_v45  ;;  %2081 = vmatpush3.bf16.msra.mxu1 %v2776_v46 }
  0x64   : > { %2002 = vmatprep.subr.bf16.mxu0 %v2456_v7  ;;  %2082 = vmatprep.subr.bf16.mxu1 %v2456_v7 }
  0x67   : > { %2003 = vmatpush3.bf16.msra.mxu0 %v2789_v49  ;;  %2083 = vmatpush3.bf16.msra.mxu1 %v2793_v50 }
  0x68   : > { %2008 = vmatprep.subr.bf16.mxu0 %v2456_v7  ;;  %2088 = vmatprep.subr.bf16.mxu1 %v2456_v7 }
  0x6a   : > { %2005 = vmatmul.mubr.msk.bf16.vlgmr.msra.gmra.mrb[0].mxu0 %vm290_vm2, %v2797_v51  ;;  %2085 = vmatmul.mubr.msk.bf16.vlgmr.msra.gmra.mrb[0].mxu1 %vm290_vm2, %v2797_v51 }
  0x6b   : > { %2009 = vmatpush3.bf16.msra.mxu0 %v2802_v52  ;;  %2089 = vmatpush3.bf16.msra.mxu1 %v2809_v53 }
  0x6c   : > { %2010 = vmatprep.subr.bf16.mxu0 %v2456_v7  ;;  %2090 = vmatprep.subr.bf16.mxu1 %v2456_v7 }
  0x6d   : > { %2020 = vmatprep.mubr.msk.bf16.mxu0 %vm2457_vm0, %v2456_v7  ;;  %2100 = vmatprep.mubr.msk.bf16.mxu1 %vm2457_vm0, %v2456_v7 }
  0x6f   : > { %2011 = vmatpush3.bf16.msra.mxu0 %v2820_v54  ;;  %2091 = vmatpush3.bf16.msra.mxu1 %v2827_v55 }
  0x70   : > { %2012 = vmatprep.subr.bf16.mxu0 %v2456_v7  ;;  %2092 = vmatprep.subr.bf16.mxu1 %v2456_v7 }
  0x73   : > { %2013 = vmatpush3.bf16.msra.mxu0 %v2838_v56  ;;  %2093 = vmatpush3.bf16.msra.mxu1 %v2845_v57 }
  0x74   : > { %2014 = vmatprep.subr.bf16.mxu0 %v2456_v7  ;;  %2094 = vmatprep.subr.bf16.mxu1 %v2456_v7 }
  0x77   : > { %2015 = vmatpush3.bf16.msra.mxu0 %v2852_v58  ;;  %2095 = vmatpush3.bf16.msra.mxu1 %v2859_v59 }
  0x78   : > { %2016 = vmatprep.subr.bf16.mxu0 %v2456_v7  ;;  %2096 = vmatprep.subr.bf16.mxu1 %v2456_v7 }
  0x7b   : > { %2017 = vmatpush3.bf16.msra.mxu0 %v2866_v60  ;;  %2097 = vmatpush3.bf16.msra.mxu1 %v2873_v61 }
  0x7c   : > { %2018 = vmatprep.subr.bf16.mxu0 %v2456_v7  ;;  %2098 = vmatprep.subr.bf16.mxu1 %v2456_v7 }
  0x7f   : > { %2019 = vmatpush3.bf16.msra.mxu0 %v2886_v0  ;;  %2099 = vmatpush3.bf16.msra.mxu1 %v2890_v1 }
  0x80   : > { %2024 = vmatprep.subr.bf16.mxu0 %v2456_v7  ;;  %2104 = vmatprep.subr.bf16.mxu1 %v2456_v7 }
  0x82   : > { %2021 = vmatmul.mubr.msk.bf16.vlgmr.msra.gmra.mrb[0].mxu0 %vm290_vm2, %v2894_v2  ;;  %2101 = vmatmul.mubr.msk.bf16.vlgmr.msra.gmra.mrb[0].mxu1 %vm290_vm2, %v2894_v2 }
  0x83   : > { %2025 = vmatpush3.bf16.msra.mxu0 %v2899_v3  ;;  %2105 = vmatpush3.bf16.msra.mxu1 %v2906_v4 }
  0x84   : > { %2026 = vmatprep.subr.bf16.mxu0 %v2456_v7  ;;  %2106 = vmatprep.subr.bf16.mxu1 %v2456_v7 }
  0x85   : > { %2036 = vmatprep.mubr.msk.bf16.mxu0 %vm2457_vm0, %v2456_v7  ;;  %2116 = vmatprep.mubr.msk.bf16.mxu1 %vm2457_vm0, %v2456_v7 }
  0x87   : > { %2027 = vmatpush3.bf16.msra.mxu0 %v2917_v5  ;;  %2107 = vmatpush3.bf16.msra.mxu1 %v2924_v17 }
  0x88   : > { %2028 = vmatprep.subr.bf16.mxu0 %v2456_v7  ;;  %2108 = vmatprep.subr.bf16.mxu1 %v2456_v7 }
  0x8b   : > { %2029 = vmatpush3.bf16.msra.mxu0 %v2935_v18  ;;  %2109 = vmatpush3.bf16.msra.mxu1 %v2942_v30  ;;  %v2991_v30 = vld [vmem:[%s2604_s4 + $0x10] sm:$0xf] }
  0x8c   : > { %2030 = vmatprep.subr.bf16.mxu0 %v2456_v7  ;;  %2110 = vmatprep.subr.bf16.mxu1 %v2456_v7 }
  0x8f   : > { %2031 = vmatpush3.bf16.msra.mxu0 %v2949_v32  ;;  %2111 = vmatpush3.bf16.msra.mxu1 %v2956_v36  ;;  %v2983_v36 = vsel %vm294_vm1, %v2430_v62, 0  ;;  %v2987_v32 = vsel %vm294_vm1, %v2431_v63, 0 }
  0x90   : > { %2032 = vmatprep.subr.bf16.mxu0 %v2456_v7  ;;  %2112 = vmatprep.subr.bf16.mxu1 %v2456_v7 }
  0x93   : > { %2033 = vmatpush3.bf16.msra.mxu0 %v2963_v47  ;;  %2113 = vmatpush3.bf16.msra.mxu1 %v2970_v48 }
  0x94   : > { %2034 = vmatprep.subr.bf16.mxu0 %v2456_v7  ;;  %2114 = vmatprep.subr.bf16.mxu1 %v2456_v7 }
  0x97   : > { %2035 = vmatpush3.bf16.msra.mxu0 %v2983_v36  ;;  %2115 = vmatpush3.bf16.msra.mxu1 %v2987_v32 }
  0x98   : > { %2120 = vmatprep.subr.bf16.mxu0 %v2456_v7  ;;  %2200 = vmatprep.subr.bf16.mxu1 %v2456_v7 }
  0x9a   : > { %2037 = vmatmul.mubr.msk.bf16.vlgmr.msra.gmra.mrb[0].mxu0 %vm290_vm2, %v2991_v30  ;;  %2117 = vmatmul.mubr.msk.bf16.vlgmr.msra.gmra.mrb[0].mxu1 %vm290_vm2, %v2991_v30 }
  0x9b   : > { %2121 = vmatpush3.bf16.msra.mxu0 %v2517_v6  ;;  %2201 = vmatpush3.bf16.msra.mxu1 %v2524_v8  ;;  %v3187_v6 = vld [vmem:[#allocation3_spill] sm:$0xff]  ;;  %v3188_v8 = vld [vmem:[#allocation4_spill] sm:$0xff] }
  0x9c   : > { %2122 = vmatprep.subr.bf16.mxu0 %v2456_v7  ;;  %2202 = vmatprep.subr.bf16.mxu1 %v2456_v7 }
  0x9d   : > { %2132 = vmatprep.mubr.msk.bf16.mxu0 %vm2457_vm0, %v2456_v7  ;;  %2212 = vmatprep.mubr.msk.bf16.mxu1 %vm2457_vm0, %v2456_v7 }
  0x9f   : > { %2123 = vmatpush3.bf16.msra.mxu0 %v2530_v9  ;;  %2203 = vmatpush3.bf16.msra.mxu1 %v2537_v10  ;;  %v3189_v9 = vld [vmem:[#allocation5_spill] sm:$0xff]  ;;  %v1810_v10 = vld [vmem:[%s2604_s4 + $0x14] sm:$0xf] }
  0xa0   : > { %2124 = vmatprep.subr.bf16.mxu0 %v2456_v7  ;;  %2204 = vmatprep.subr.bf16.mxu1 %v2456_v7 }
  0xa3   : > { %2125 = vmatpush3.bf16.msra.mxu0 %v2548_v11  ;;  %2205 = vmatpush3.bf16.msra.mxu1 %v2555_v12 }
  0xa4   : > { %2126 = vmatprep.subr.bf16.mxu0 %v2456_v7  ;;  %2206 = vmatprep.subr.bf16.mxu1 %v2456_v7 }
  0xa7   : > { %2127 = vmatpush3.bf16.msra.mxu0 %v2562_v13  ;;  %2207 = vmatpush3.bf16.msra.mxu1 %v2570_v14 }
  0xa8   : > { %2128 = vmatprep.subr.bf16.mxu0 %v2456_v7  ;;  %2208 = vmatprep.subr.bf16.mxu1 %v2456_v7 }
  0xab   : > { %2129 = vmatpush3.bf16.msra.mxu0 %v2576_v15  ;;  %2209 = vmatpush3.bf16.msra.mxu1 %v2581_v16 }
  0xac   : > { %2130 = vmatprep.subr.bf16.mxu0 %v2456_v7  ;;  %2210 = vmatprep.subr.bf16.mxu1 %v2456_v7 }
  0xaf   : > { %2131 = vmatpush3.bf16.msra.mxu0 %v2597_v19  ;;  %2211 = vmatpush3.bf16.msra.mxu1 %v2601_v20 }
  0xb0   : > { %2136 = vmatprep.subr.bf16.mxu0 %v2456_v7  ;;  %2216 = vmatprep.subr.bf16.mxu1 %v2456_v7 }
  0xb2   : > { %2133 = vmatmul.mubr.msk.bf16.vlgmr.msra.gmra.mrb[4].mxu0 %vm290_vm2, %v2797_v51  ;;  %2213 = vmatmul.mubr.msk.bf16.vlgmr.msra.gmra.mrb[4].mxu1 %vm290_vm2, %v2797_v51 }
  0xb3   : > { %2137 = vmatpush3.bf16.msra.mxu0 %v2612_v22  ;;  %2217 = vmatpush3.bf16.msra.mxu1 %v2619_v23 }
  0xb4   : > { %2138 = vmatprep.subr.bf16.mxu0 %v2456_v7  ;;  %2218 = vmatprep.subr.bf16.mxu1 %v2456_v7 }
  0xb5   : > { %2148 = vmatprep.mubr.msk.bf16.mxu0 %vm2457_vm0, %v2456_v7  ;;  %2228 = vmatprep.mubr.msk.bf16.mxu1 %vm2457_vm0, %v2456_v7 }
  0xb7   : > { %2139 = vmatpush3.bf16.msra.mxu0 %v2625_v24  ;;  %2219 = vmatpush3.bf16.msra.mxu1 %v2632_v25  ;;  %v1817_v25 = vld [vmem:[%s3179_s2] ss:$0 sm:$0xff] }
  0xb8   : > { %2140 = vmatprep.subr.bf16.mxu0 %v2456_v7  ;;  %2220 = vmatprep.subr.bf16.mxu1 %v2456_v7 }
  0xbb   : > { %2141 = vmatpush3.bf16.msra.mxu0 %v2648_v26  ;;  %2221 = vmatpush3.bf16.msra.mxu1 %v2655_v27 }
  0xbc   : > { %2142 = vmatprep.subr.bf16.mxu0 %v2456_v7  ;;  %2222 = vmatprep.subr.bf16.mxu1 %v2456_v7 }
  0xbf   : > { %2143 = vmatpush3.bf16.msra.mxu0 %v2662_v28  ;;  %2223 = vmatpush3.bf16.msra.mxu1 %v2669_v29 }
  0xc0   : > { %2144 = vmatprep.subr.bf16.mxu0 %v2456_v7  ;;  %2224 = vmatprep.subr.bf16.mxu1 %v2456_v7 }
  0xc3   : > { %2145 = vmatpush3.bf16.msra.mxu0 %v2679_v31  ;;  %2225 = vmatpush3.bf16.msra.mxu1 %v2689_v33 }
  0xc4   : > { %2146 = vmatprep.subr.bf16.mxu0 %v2456_v7  ;;  %2226 = vmatprep.subr.bf16.mxu1 %v2456_v7 }
  0xc7   : > { %2147 = vmatpush3.bf16.msra.mxu0 %v2696_v34  ;;  %2227 = vmatpush3.bf16.msra.mxu1 %v2700_v35 }
  0xc8   : > { %2152 = vmatprep.subr.bf16.mxu0 %v2456_v7  ;;  %2232 = vmatprep.subr.bf16.mxu1 %v2456_v7 }
  0xca   : > { %2149 = vmatmul.mubr.msk.bf16.vlgmr.msra.gmra.mrb[4].mxu0 %vm290_vm2, %v2607_v21  ;;  %2229 = vmatmul.mubr.msk.bf16.vlgmr.msra.gmra.mrb[4].mxu1 %vm290_vm2, %v2607_v21 }
  0xcb   : > { %2153 = vmatpush3.bf16.msra.mxu0 %v2707_v37  ;;  %2233 = vmatpush3.bf16.msra.mxu1 %v2714_v38 }
  0xcc   : > { %2154 = vmatprep.subr.bf16.mxu0 %v2456_v7  ;;  %2234 = vmatprep.subr.bf16.mxu1 %v2456_v7 }
  0xcd   : > { %2164 = vmatprep.mubr.msk.bf16.mxu0 %vm2457_vm0, %v2456_v7  ;;  %2244 = vmatprep.mubr.msk.bf16.mxu1 %vm2457_vm0, %v2456_v7 }
  0xcf   : > { %2155 = vmatpush3.bf16.msra.mxu0 %v2720_v39  ;;  %2235 = vmatpush3.bf16.msra.mxu1 %v2730_v40 }
  0xd0   : > { %2156 = vmatprep.subr.bf16.mxu0 %v2456_v7  ;;  %2236 = vmatprep.subr.bf16.mxu1 %v2456_v7 }
  0xd3   : > { %2157 = vmatpush3.bf16.msra.mxu0 %v2741_v41  ;;  %2237 = vmatpush3.bf16.msra.mxu1 %v2748_v42 }
  0xd4   : > { %2158 = vmatprep.subr.bf16.mxu0 %v2456_v7  ;;  %2238 = vmatprep.subr.bf16.mxu1 %v2456_v7 }
  0xd7   : > { %2159 = vmatpush3.bf16.msra.mxu0 %v2755_v43  ;;  %2239 = vmatpush3.bf16.msra.mxu1 %v2762_v44 }
  0xd8   : > { %2160 = vmatprep.subr.bf16.mxu0 %v2456_v7  ;;  %2240 = vmatprep.subr.bf16.mxu1 %v2456_v7 }
  0xdb   : > { %2161 = vmatpush3.bf16.msra.mxu0 %v2769_v45  ;;  %2241 = vmatpush3.bf16.msra.mxu1 %v2776_v46 }
  0xdc   : > { %2162 = vmatprep.subr.bf16.mxu0 %v2456_v7  ;;  %2242 = vmatprep.subr.bf16.mxu1 %v2456_v7 }
  0xdf   : > { %2163 = vmatpush3.bf16.msra.mxu0 %v2789_v49  ;;  %2243 = vmatpush3.bf16.msra.mxu1 %v2793_v50 }
  0xe0   : > { %2168 = vmatprep.subr.bf16.mxu0 %v2456_v7  ;;  %2248 = vmatprep.subr.bf16.mxu1 %v2456_v7 }
  0xe2   : > { %2165 = vmatmul.mubr.msk.bf16.vlgmr.msra.gmra.mrb[4].mxu0 %vm290_vm2, %v2894_v2  ;;  %2245 = vmatmul.mubr.msk.bf16.vlgmr.msra.gmra.mrb[4].mxu1 %vm290_vm2, %v2894_v2 }
  0xe3   : > { %2169 = vmatpush3.bf16.msra.mxu0 %v2802_v52  ;;  %2249 = vmatpush3.bf16.msra.mxu1 %v2809_v53 }
  0xe4   : > { %2170 = vmatprep.subr.bf16.mxu0 %v2456_v7  ;;  %2250 = vmatprep.subr.bf16.mxu1 %v2456_v7 }
  0xe5   : > { %2180 = vmatprep.mubr.msk.bf16.mxu0 %vm2457_vm0, %v2456_v7  ;;  %2260 = vmatprep.mubr.msk.bf16.mxu1 %vm2457_vm0, %v2456_v7 }
  0xe7   : > { %2171 = vmatpush3.bf16.msra.mxu0 %v2820_v54  ;;  %2251 = vmatpush3.bf16.msra.mxu1 %v2827_v55 }
  0xe8   : > { %2172 = vmatprep.subr.bf16.mxu0 %v2456_v7  ;;  %2252 = vmatprep.subr.bf16.mxu1 %v2456_v7 }
  0xeb   : > { %2173 = vmatpush3.bf16.msra.mxu0 %v2838_v56  ;;  %2253 = vmatpush3.bf16.msra.mxu1 %v2845_v57 }
  0xec   : > { %2174 = vmatprep.subr.bf16.mxu0 %v2456_v7  ;;  %2254 = vmatprep.subr.bf16.mxu1 %v2456_v7 }
  0xef   : > { %2175 = vmatpush3.bf16.msra.mxu0 %v2852_v58  ;;  %2255 = vmatpush3.bf16.msra.mxu1 %v2859_v59 }
  0xf0   : > { %2176 = vmatprep.subr.bf16.mxu0 %v2456_v7  ;;  %2256 = vmatprep.subr.bf16.mxu1 %v2456_v7 }
  0xf3   : > { %2177 = vmatpush3.bf16.msra.mxu0 %v2866_v60  ;;  %2257 = vmatpush3.bf16.msra.mxu1 %v2873_v61 }
  0xf4   : > { %2178 = vmatprep.subr.bf16.mxu0 %v2456_v7  ;;  %2258 = vmatprep.subr.bf16.mxu1 %v2456_v7 }
  0xf7   : > { %2179 = vmatpush3.bf16.msra.mxu0 %v2886_v0  ;;  %2259 = vmatpush3.bf16.msra.mxu1 %v2890_v1 }
  0xf8   : > { %2184 = vmatprep.subr.bf16.mxu0 %v2456_v7  ;;  %2264 = vmatprep.subr.bf16.mxu1 %v2456_v7 }
  0xfa   : > { %2181 = vmatmul.mubr.msk.bf16.vlgmr.msra.gmra.mrb[4].mxu0 %vm290_vm2, %v2991_v30  ;;  %2261 = vmatmul.mubr.msk.bf16.vlgmr.msra.gmra.mrb[4].mxu1 %vm290_vm2, %v2991_v30 }
  0xfb   : > { %2185 = vmatpush3.bf16.msra.mxu0 %v2899_v3  ;;  %2265 = vmatpush3.bf16.msra.mxu1 %v2906_v4 }
  0xfc   : > { %2186 = vmatprep.subr.bf16.mxu0 %v2456_v7  ;;  %2266 = vmatprep.subr.bf16.mxu1 %v2456_v7 }
  0xfd   : > { %2196 = vmatprep.mubr.msk.bf16.mxu0 %vm2457_vm0, %v2456_v7  ;;  %2276 = vmatprep.mubr.msk.bf16.mxu1 %vm2457_vm0, %v2456_v7 }
  0xff   : > { %2187 = vmatpush3.bf16.msra.mxu0 %v2917_v5  ;;  %2267 = vmatpush3.bf16.msra.mxu1 %v2924_v17 }
 0x100   : > { %2188 = vmatprep.subr.bf16.mxu0 %v2456_v7  ;;  %2268 = vmatprep.subr.bf16.mxu1 %v2456_v7 }
 0x103   : > { %2189 = vmatpush3.bf16.msra.mxu0 %v2935_v18  ;;  %2269 = vmatpush3.bf16.msra.mxu1 %v3187_v6 }
 0x104   : > { %2190 = vmatprep.subr.bf16.mxu0 %v2456_v7  ;;  %2270 = vmatprep.subr.bf16.mxu1 %v2456_v7 }
 0x107   : > { %2191 = vmatpush3.bf16.msra.mxu0 %v3188_v8  ;;  %2271 = vmatpush3.bf16.msra.mxu1 %v3189_v9 }
 0x108   : > { %2192 = vmatprep.subr.bf16.mxu0 %v2456_v7  ;;  %2272 = vmatprep.subr.bf16.mxu1 %v2456_v7 }
 0x10b   : > { %2193 = vmatpush3.bf16.msra.mxu0 %v2963_v47  ;;  %2273 = vmatpush3.bf16.msra.mxu1 %v2970_v48 }
 0x10c   : > { %2194 = vmatprep.subr.bf16.mxu0 %v2456_v7  ;;  %2274 = vmatprep.subr.bf16.mxu1 %v2456_v7 }
 0x10f   : > { %2195 = vmatpush3.bf16.msra.mxu0 %v2983_v36  ;;  %2275 = vmatpush3.bf16.msra.mxu1 %v2987_v32 }
 0x112   : > { %2197 = vmatmul.mubr.msk.bf16.vlgmr.msra.gmra.mrb[4].mxu0 %vm290_vm2, %v1810_v10  ;;  %2277 = vmatmul.mubr.msk.bf16.vlgmr.msra.gmra.mrb[4].mxu1 %vm290_vm2, %v1810_v10 }
 0x16d   : > { %v692_v11 = vpop.f32.mrb[0].mxu0  ;;  %v1135_v12 = vpop.f32.mrb[0].mxu1 }
 0x16e   : > { %v2038_v13 = vpop.f32.mrb[1].mxu0  ;;  %v1142_v14 = vmax.f32 %v692_v11, %v1135_v12  ;;  %v2118_v15 = vpop.f32.mrb[1].mxu1 }
 0x16f   : > { %v695_v16 = vpop.f32.mrb[2].mxu0  ;;  %v1138_v19 = vpop.f32.mrb[2].mxu1 }
 0x170   : > { %v2039_v20 = vpop.f32.mrb[3].mxu0  ;;  %v2119_v21 = vpop.f32.mrb[3].mxu1 }
 0x1e5   : > { %v1344_v7 = vpop.f32.mrb[4].mxu0  ;;  %v1548_v23 = vpop.f32.mrb[4].mxu1 }
 0x1e6   : > { %v1351_v22 = vmax.f32 %v1142_v14, %v1344_v7  ;;  %v2198_v24 = vpop.f32.mrb[5].mxu0  ;;  %v2278_v26 = vpop.f32.mrb[5].mxu1 }
 0x1e7   : > { %v1347_v27 = vpop.f32.mrb[6].mxu0  ;;  %v1551_v29 = vpop.f32.mrb[6].mxu1 }
 0x1e8   : > { %v1555_v28 = vmax.f32 %v1351_v22, %v1548_v23  ;;  %v2199_v31 = vpop.f32.mrb[7].mxu0  ;;  %v2279_v33 = vpop.f32.mrb[7].mxu1 }
 0x1ea   : > { %v1563_v34 = vadd.f32 %v1817_v25, %v1555_v28 }
 0x1ec   : > { %v1564_v35 = vmax.f32 %v1563_v34, 0.0 }
 0x1ee   : > { %v1565_v37 = vpack.c.bf16 %v1564_v35, %v1564_v35 }
 0x1f0   : > { %1566 = vst [vmem:[%s229_s14] sm:$0xf] %v1565_v37 }
 0x1f1 PF: > { %p10_p9 = scmp.ge.s32.totalorder %s2495_s16, 4   ;;  %s3190_s12 = smov %s2450_s13 }
 0x1f2   : > { %s3191_s13 = smov %s2504_s19  ;;  %s3192_s14 = smov %s2495_s16 }
 0x1f3   :  { %12 = sbr.rel (!%p10_p9) target bundleno = 2 (0x2), region = 122 }

// kernel: net_forward.5
= control target key start
LH: loop header
LB: loop body
LE: loop exit
PB: predicated region body
PF: predicated region fallthrough
CT: control target
= control target key end

     0   :  { %v741_v0 = vmov 0   ;;  %vm249_vm0 = vcmask 130048   ;;  %v742_v32 = vmov 0.0   ;;  %vm743_vm1 = vmmov 0   ;;  %s952_s1 = inlined_call_operand.vmem [shape: bf16[400,128], index: 1, kind: input, shape index: {}]   ;;  %s953_s0 = inlined_call_operand.vmem [shape: bf16[8,400], index: 0, kind: input, shape index: {}]   ;;  %s954_s3 = inlined_call_operand.vmem [shape: bf16[128,128], index: 3, kind: input, shape index: {}]   ;;  %s955_s5 = inlined_call_operand.vmem [shape: bf16[128,128], index: 5, kind: input, shape index: {}]   ;;  %s956_s2 = inlined_call_operand.vmem [shape: f32[1,128], index: 2, kind: input, shape index: {}]   ;;  %s957_s4 = inlined_call_operand.vmem [shape: f32[1,128], index: 4, kind: input, shape index: {}]   ;;  %s958_s6 = inlined_call_operand.vmem [shape: f32[1,128], index: 6, kind: input, shape index: {}]   ;;  %s959_s7 = inlined_call_operand.vmem [shape: f32[8,128], index: 7, kind: output, shape index: {}]  }
   0x1   :  { %293 = vmatprep.subr.bf16.mxu1 %v741_v0  ;;  %v696_v1 = vld [vmem:[%s952_s1 + $0x40] sm:$0xff]   ;;  %v699_v4 = vld [vmem:[%s952_s1 + $0x48] sm:$0xff]   ;;  %v702_v7 = vld [vmem:[%s952_s1 + $0x50] sm:$0xff]  }
   0x2   :  { %v697_v2 = vld [vmem:[%s952_s1 + $0x80] sm:$0xff]   ;;  %613 = vmatprep.subr.bf16.mxu0 %v696_v1  ;;  %v700_v5 = vld [vmem:[%s952_s1 + $0x88] sm:$0xff]   ;;  %v703_v8 = vld [vmem:[%s952_s1 + $0x90] sm:$0xff]  }
   0x3   :  { %v698_v3 = vld [vmem:[%s952_s1] sm:$0xff]   ;;  %294 = vmatpush1.bf16.msra.mxu1 %v697_v2  ;;  %v701_v6 = vld [vmem:[%s952_s1 + $0x8] sm:$0xff]   ;;  %v704_v9 = vld [vmem:[%s952_s1 + $0x10] sm:$0xff]  }
   0x4   :  { %614 = vmatpush3.bf16.msra.mxu0 %v698_v3  ;;  %295 = vmatprep.subr.bf16.mxu1 %v741_v0  ;;  %v705_v10 = vld [vmem:[%s952_s1 + $0x58] sm:$0xff]   ;;  %v708_v13 = vld [vmem:[%s952_s1 + $0x60] sm:$0xff]   ;;  %v711_v16 = vld [vmem:[%s952_s1 + $0x68] sm:$0xff]  }
   0x5   :  { %615 = vmatprep.subr.bf16.mxu0 %v699_v4  ;;  %v706_v11 = vld [vmem:[%s952_s1 + $0x98] sm:$0xff]   ;;  %v709_v14 = vld [vmem:[%s952_s1 + $0xa0] sm:$0xff]   ;;  %v712_v17 = vld [vmem:[%s952_s1 + $0xa8] sm:$0xff]  }
   0x6   :  { %v707_v12 = vld [vmem:[%s952_s1 + $0x18] sm:$0xff]   ;;  %v710_v15 = vld [vmem:[%s952_s1 + $0x20] sm:$0xff]   ;;  %v713_v18 = vld [vmem:[%s952_s1 + $0x28] sm:$0xff]  }
   0x7   :  { %296 = vmatpush1.bf16.msra.mxu1 %v700_v5  ;;  %v714_v19 = vld [vmem:[%s952_s1 + $0x70] sm:$0xff]   ;;  %v27_v22 = vld [vmem:[%s953_s0] sm:$0xff]  ;;  %v717_v23 = vld [vmem:[%s952_s1 + $0x78] sm:$0xff]  }
   0x8   :  { %616 = vmatpush3.bf16.msra.mxu0 %v701_v6  ;;  %297 = vmatprep.subr.bf16.mxu1 %v741_v0  ;;  %v715_v20 = vld [vmem:[%s952_s1 + $0xb0] sm:$0xff]   ;;  %v566_v24 = vcombine.high %v27_v22, %v27_v22  ;;  %v28_v25 = vld [vmem:[%s953_s0 + $0x8] sm:$0xff]  ;;  %v718_v27 = vld [vmem:[%s952_s1 + $0xb8] sm:$0xff]   ;;  %v565_v30 = vcombine.low %v27_v22, %v27_v22 }
   0x9   :  { %617 = vmatprep.subr.bf16.mxu0 %v702_v7  ;;  %v716_v21 = vld [vmem:[%s952_s1 + $0x30] sm:$0xff]   ;;  %v568_v26 = vcombine.high %v28_v25, %v28_v25  ;;  %v719_v28 = vld [vmem:[%s952_s1 + $0x38] sm:$0xff]   ;;  %v722_v29 = vld [vmem:[%s952_s1 + $0xc0] sm:$0xff]   ;;  %v567_v33 = vcombine.low %v28_v25, %v28_v25 }
   0xa   :  { %285 = vmatprep.mubr.bf16.mxu0 %v566_v24  ;;  %v725_v31 = vld [vmem:[%s954_s3] sm:$0xff]   ;;  %v726_v34 = vld [vmem:[%s954_s3 + $0x8] sm:$0xff]   ;;  %v727_v35 = vld [vmem:[%s954_s3 + $0x10] sm:$0xff]  }
   0xb   :  { %298 = vmatpush1.bf16.msra.mxu1 %v703_v8  ;;  %594 = vmatprep.mubr.msk.bf16.mxu1 %vm249_vm0, %v568_v26  ;;  %v728_v36 = vld [vmem:[%s954_s3 + $0x18] sm:$0xff]   ;;  %v729_v37 = vld [vmem:[%s954_s3 + $0x20] sm:$0xff]   ;;  %v730_v38 = vld [vmem:[%s954_s3 + $0x28] sm:$0xff]  }
   0xc   :  { %618 = vmatpush3.bf16.msra.mxu0 %v704_v9  ;;  %299 = vmatprep.subr.bf16.mxu1 %v741_v0  ;;  %v731_v39 = vld [vmem:[%s954_s3 + $0x30] sm:$0xff]   ;;  %v732_v40 = vld [vmem:[%s954_s3 + $0x38] sm:$0xff]   ;;  %v733_v41 = vld [vmem:[%s955_s5] sm:$0xff]  }
   0xd   :  { %619 = vmatprep.subr.bf16.mxu0 %v705_v10  ;;  %v734_v42 = vld [vmem:[%s955_s5 + $0x8] sm:$0xff]   ;;  %v735_v43 = vld [vmem:[%s955_s5 + $0x10] sm:$0xff]   ;;  %v736_v44 = vld [vmem:[%s955_s5 + $0x18] sm:$0xff]  }
   0xe   :  { %v737_v45 = vld [vmem:[%s955_s5 + $0x20] sm:$0xff]   ;;  %v738_v46 = vld [vmem:[%s955_s5 + $0x28] sm:$0xff]   ;;  %v739_v61 = vld [vmem:[%s955_s5 + $0x30] sm:$0xff]  }
   0xf   :  { %300 = vmatpush1.bf16.msra.mxu1 %v706_v11  ;;  %v564_v49 = vld [vmem:[%s956_s2] ss:$0 sm:$0xff]  ;;  %v740_v62 = vld [vmem:[%s955_s5 + $0x38] sm:$0xff]  }
  0x10   :  { %620 = vmatpush3.bf16.msra.mxu0 %v707_v12  ;;  %301 = vmatprep.subr.bf16.mxu1 %v741_v0  ;;  %v595_v63 = vld [vmem:[%s957_s4] ss:$0 sm:$0xff] }
  0x11   :  { %621 = vmatprep.subr.bf16.mxu0 %v708_v13  ;;  %v604_v7 = vld [vmem:[%s958_s6] ss:$0 sm:$0xff] }
  0x13   :  { %302 = vmatpush1.bf16.msra.mxu1 %v709_v14 }
  0x14   :  { %622 = vmatpush3.bf16.msra.mxu0 %v710_v15  ;;  %303 = vmatprep.subr.bf16.mxu1 %v741_v0 }
  0x15   :  { %623 = vmatprep.subr.bf16.mxu0 %v711_v16 }
  0x17   :  { %304 = vmatpush1.bf16.msra.mxu1 %v712_v17 }
  0x18   :  { %624 = vmatpush3.bf16.msra.mxu0 %v713_v18  ;;  %305 = vmatprep.subr.bf16.mxu1 %v741_v0 }
  0x19   :  { %625 = vmatprep.subr.bf16.mxu0 %v714_v19 }
  0x1b   :  { %306 = vmatpush1.bf16.msra.mxu1 %v715_v20 }
  0x1c   :  { %626 = vmatpush3.bf16.msra.mxu0 %v716_v21  ;;  %307 = vmatprep.subr.bf16.mxu1 %v741_v0 }
  0x1d   :  { %627 = vmatprep.subr.bf16.mxu0 %v717_v23 }
  0x1f   :  { %308 = vmatpush1.bf16.msra.mxu1 %v718_v27 }
  0x20   :  { %628 = vmatpush3.bf16.msra.mxu0 %v719_v28  ;;  %309 = vmatprep.subr.bf16.mxu1 %v741_v0 }
  0x21   :  { %653 = vmatprep.subr.bf16.mxu0 %v742_v32 }
  0x23   :  { %286 = vmatmul.mubr.bf16.vlgmr.msra.gmra.mrb[0].mxu0 %v565_v30  ;;  %310 = vmatpush1.bf16.msra.mxu1 %v722_v29 }
  0x24   :  { %654 = vmatpush3.bf16.msra.mxu0 %v725_v31  ;;  %673 = vmatprep.subr.bf16.mxu1 %v742_v32 }
  0x25   :  { %655 = vmatprep.subr.bf16.mxu0 %v742_v32  ;;  %669 = vmatprep.mubr.msk.bf16.mxu0 %vm743_vm1, %v742_v32 }
  0x26   :  { %326 = vmatmul.mubr.bf16.vlgmr.msra.gmra.mrb[0].mxu1 %v567_v33 }
  0x27   :  { %689 = vmatprep.mubr.msk.bf16.mxu1 %vm743_vm1, %v742_v32  ;;  %674 = vmatpush3.bf16.msra.mxu1 %v733_v41 }
  0x28   :  { %656 = vmatpush3.bf16.msra.mxu0 %v726_v34  ;;  %675 = vmatprep.subr.bf16.mxu1 %v742_v32 }
  0x29   :  { %657 = vmatprep.subr.bf16.mxu0 %v742_v32 }
  0x2b   :  { %676 = vmatpush3.bf16.msra.mxu1 %v734_v42 }
  0x2c   :  { %658 = vmatpush3.bf16.msra.mxu0 %v727_v35  ;;  %677 = vmatprep.subr.bf16.mxu1 %v742_v32 }
  0x2d   :  { %659 = vmatprep.subr.bf16.mxu0 %v742_v32 }
  0x2f   :  { %678 = vmatpush3.bf16.msra.mxu1 %v735_v43 }
  0x30   :  { %660 = vmatpush3.bf16.msra.mxu0 %v728_v36  ;;  %679 = vmatprep.subr.bf16.mxu1 %v742_v32 }
  0x31   :  { %661 = vmatprep.subr.bf16.mxu0 %v742_v32 }
  0x33   :  { %680 = vmatpush3.bf16.msra.mxu1 %v736_v44 }
  0x34   :  { %662 = vmatpush3.bf16.msra.mxu0 %v729_v37  ;;  %681 = vmatprep.subr.bf16.mxu1 %v742_v32 }
  0x35   :  { %663 = vmatprep.subr.bf16.mxu0 %v742_v32 }
  0x37   :  { %682 = vmatpush3.bf16.msra.mxu1 %v737_v45 }
  0x38   :  { %664 = vmatpush3.bf16.msra.mxu0 %v730_v38  ;;  %683 = vmatprep.subr.bf16.mxu1 %v742_v32 }
  0x39   :  { %665 = vmatprep.subr.bf16.mxu0 %v742_v32 }
  0x3b   :  { %684 = vmatpush3.bf16.msra.mxu1 %v738_v46 }
  0x3c   :  { %666 = vmatpush3.bf16.msra.mxu0 %v731_v39  ;;  %685 = vmatprep.subr.bf16.mxu1 %v742_v32 }
  0x3d   :  { %667 = vmatprep.subr.bf16.mxu0 %v742_v32 }
  0x3f   :  { %686 = vmatpush3.bf16.msra.mxu1 %v739_v61 }
  0x40   :  { %668 = vmatpush3.bf16.msra.mxu0 %v732_v40  ;;  %687 = vmatprep.subr.bf16.mxu1 %v742_v32 }
  0x43   :  { %688 = vmatpush3.bf16.msra.mxu1 %v740_v62 }
  0xf6   :  { %v629_v47 = vpop.f32.mrb[0].mxu0 }
  0xf7   :  { %v630_v48 = vpop.f32.mrb[1].mxu0 }
  0xf8   :  { %v631_v50 = vadd.f32 %v630_v48, %v629_v47  ;;  %v632_v51 = vpop.f32.mrb[2].mxu0 }
  0xf9   :  { %v633_v52 = vpop.f32.mrb[3].mxu0  ;;  %v327_v53 = vpop.f32.mrb[0].mxu1 }
  0xfa   :  { %v288_v54 = vadd.f32 %v631_v50, %v564_v49  ;;  %v329_v55 = vpop.f32.mrb[1].mxu1 }
  0xfb   :  { %v330_v56 = vpop.f32.mrb[2].mxu1 }
  0xfc   :  { %v328_v57 = vadd.f32 %v327_v53, %v288_v54  ;;  %v331_v58 = vpop.f32.mrb[3].mxu1 }
  0xfe   :  { %v333_v59 = vmax.f32 %v328_v57, 0.0 }
 0x100   :  { %v334_v60 = vpack.c.bf16 %v333_v59, %v333_v59 }
 0x102   :  { %670 = vmatmul.mubr.bf16.vlgmr.msra.gmra.mrb[4].mxu0 %v334_v60 }
 0x1d5   :  { %v440_v0 = vpop.f32.mrb[4].mxu0 }
 0x1d6   :  { %v441_v1 = vadd.f32 %v595_v63, %v440_v0  ;;  %v671_v2 = vpop.f32.mrb[5].mxu0 }
 0x1d7   :  { %v443_v3 = vpop.f32.mrb[6].mxu0 }
 0x1d8   :  { %v446_v4 = vmax.f32 %v441_v1, 0.0  ;;  %v672_v5 = vpop.f32.mrb[7].mxu0 }
 0x1da   :  { %v447_v6 = vpack.c.bf16 %v446_v4, %v446_v4 }
 0x1dc   :  { %690 = vmatmul.mubr.bf16.vlgmr.msra.gmra.mrb[4].mxu1 %v447_v6 }
 0x2af   :  { %v553_v8 = vpop.f32.mrb[4].mxu1 }
 0x2b0   :  { %v554_v9 = vadd.f32 %v604_v7, %v553_v8  ;;  %v691_v10 = vpop.f32.mrb[5].mxu1 }
 0x2b1   :  { %v556_v11 = vpop.f32.mrb[6].mxu1 }
 0x2b2   :  { %559 = vst [vmem:[%s959_s7] sm:$0xff] %v554_v9  ;;  %v692_v12 = vpop.f32.mrb[7].mxu1 }

</bundles_post_ra>
